<compile_context>
chip_gen: v7x
topology: tpu7x:2x2x1
jax: 0.10.0
libtpu: 0.0.40
codegen_flags: <defaults>
</compile_context>

<pallas_src>
import functools

import jax
import jax.numpy as jnp
import numpy as np
from jax.experimental import pallas as pl
from jax.experimental.pallas import tpu as pltpu

EPS = 1e-8
LANE = 128


def _round_up(v, m):
    return (v + m - 1) // m * m


def actlayer_kernel(xt_ref, p_ref, out_ref, *, d):
    """One batch block (flipped layout: k on sublanes, batch on lanes).

    xt_ref : (Dj, TBL)     x transposed: features j on sublanes, batch on lanes
    p_ref  : (d+3, Dk, 1)  rows 0..d-1 = Cs[j, :] columns, row d = freq,
                           row d+1 = phases, row d+2 = offset
    out_ref: (Dk, TBL)     outputs: k on sublanes, batch on lanes
    """
    freq = p_ref[d]        # (Dk, 1) -> broadcasts along lanes (batch)
    ph = p_ref[d + 1]      # (Dk, 1)
    off = p_ref[d + 2]     # (Dk, 1)

    acc = jnp.zeros(out_ref.shape, jnp.float32)
    # j-accumulation, statically unrolled (d is small & static).  Keeps only a
    # (Dk, TBL) slab live; adds are plain VALU work, no sublane reduce.
    for j in range(d):
        xj = xt_ref[j:j + 1, :]          # (1, TBL): broadcasts along sublanes (k)
        csj = p_ref[j]                   # (Dk, 1):  broadcasts along lanes (batch)
        acc = acc + csj * jnp.sin(freq * xj + ph)
    out_ref[...] = acc - off


def act_layer_batched(xs, betas, lambdas, frequencies, phases, eps=EPS):
    """Batched ActLayer forward. xs: (B, d) -> (B, d). Requires d == N."""
    xs = jnp.asarray(xs, jnp.float32)
    betas = jnp.asarray(betas, jnp.float32)
    lambdas = jnp.asarray(lambdas, jnp.float32)
    freq = jnp.asarray(frequencies, jnp.float32).reshape(-1)
    ph = jnp.asarray(phases, jnp.float32).reshape(-1)

    B, d = xs.shape
    m, N = betas.shape
    assert lambdas.shape == (m, d)
    assert d == N, "reference einsum 'ij,jk,ik->k' requires d == N"
    D = d

    # ---------- hoisted x-independent work (runs once, in XLA) ----------
    mean = jnp.exp(-freq * freq * 0.5) * jnp.sin(ph)                           # (N,)
    var = 0.5 - jnp.exp(-2.0 * freq * freq) * jnp.cos(2.0 * ph) * 0.5 - mean * mean
    # NOTE: clamp; the reference would NaN if var rounds slightly negative.
    std = jnp.sqrt(jnp.maximum(var, 0.0))
    inv_std = 1.0 / (std + eps)
    # C[j, k] = sum_i betas[i, j] * lambdas[i, k]   -> (N, d)
    C = jnp.dot(betas.T, lambdas, preferred_element_type=jnp.float32)
    Cs = C * inv_std[None, :]                                                  # (N, d)
    offset = mean * inv_std * jnp.sum(C, axis=0)                               # (N,)

    # ---------- flipped-layout padding: k / j on sublanes (pad to 8) ----------
    Dj = _round_up(D, 8)   # feature rows of x^T (sublane axis)
    Dk = _round_up(D, 8)   # basis / output rows  (sublane axis)

    # Batch tile on lanes.  Single grid step for small batches; otherwise cap
    # so (x block + out block), double-buffered, stays well inside scoped VMEM
    # on every generation (16 MiB default on v5e).
    bytes_per_lane = 4 * (Dj + Dk)
    tbl_cap = max(LANE, min(4096, ((2 << 20) // bytes_per_lane) // LANE * LANE))
    Bp = _round_up(max(B, 1), LANE)
    if Bp <= tbl_cap:
        TBL = Bp               # one grid step (tiny batches are overhead-bound)
    else:
        TBL = tbl_cap          # >= 2 steps -> both v7x TensorCores get work
        Bp = _round_up(B, TBL)

    # x transposed: padded j rows are never read (loop runs j < D); padded
    # batch lanes compute garbage that is sliced off below.
    xt_p = jnp.zeros((Dj, Bp), jnp.float32).at[:D, :B].set(xs.T)

    # Single packed, resident parameter array (Cs columns + freq + ph + offset).
    # Padded k rows are zero, so they contribute nothing.
    params = jnp.zeros((D + 3, Dk, 1), jnp.float32)
    params = params.at[:D, :D, 0].set(Cs)
    params = params.at[D, :D, 0].set(freq)
    params = params.at[D + 1, :D, 0].set(ph)
    params = params.at[D + 2, :D, 0].set(offset)

    grid = (Bp // TBL,)
    out = pl.pallas_call(
        functools.partial(actlayer_kernel, d=D),
        out_shape=jax.ShapeDtypeStruct((Dk, Bp), jnp.float32),
        grid=grid,
        in_specs=[
            pl.BlockSpec((Dj, TBL), lambda b: (0, b)),          # x^T: batch-blocked
            pl.BlockSpec((D + 3, Dk, 1), lambda b: (0, 0, 0)),  # params: resident
        ],
        out_specs=pl.BlockSpec((Dk, TBL), lambda b: (0, b)),
        compiler_params=pltpu.CompilerParams(
            # Batch blocks are independent; shards across v7x's 2 TCs when
            # grid > 1 (measured no-op on v5e/v6e).
            dimension_semantics=("parallel",),
        ),
    )(xt_p, params)
    return out[:D, :B].T


def act_layer(x, betas, lambdas, frequencies, phases, eps=EPS):
    """Single-sample forward matching the PyTorch module: x (d,) -> (d,)."""
    return act_layer_batched(
        jnp.asarray(x).reshape(1, -1), betas, lambdas, frequencies, phases, eps
    )[0]


def act_layer_ref(x, betas, lambdas, frequencies, phases, eps=EPS):
    """Pure-JAX transcription of the PyTorch forward (for verification)."""
    mean = jnp.exp(-frequencies ** 2 / 2) * jnp.sin(phases)
    var = 0.5 - jnp.exp(-2 * frequencies ** 2) * jnp.cos(2 * phases) / 2 - mean ** 2
    std = jnp.sqrt(var)
    Bx = (jnp.sin(frequencies * x.reshape(-1, 1) + phases) - mean) / (std + eps)
    return jnp.einsum('ij,jk,ik->k', betas, Bx, lambdas)


if __name__ == "__main__":
    # Small shapes: d == N == 8 (required by the reference einsum), m == 16, batch == 16.
    d, m, N = 8, 16, 8
    batch = 16

    key = jax.random.PRNGKey(0)
    k_beta, k_lam, k_freq, k_x = jax.random.split(key, 4)

    # Deterministic init mirroring ActLayer.__init__(init='uniform', bias=False)
    betas = jax.random.uniform(
        k_beta, (m, N), jnp.float32,
        minval=-jnp.sqrt(3.0 * N), maxval=jnp.sqrt(3.0 * N))
    lambdas = jax.random.uniform(
        k_lam, (m, d), jnp.float32,
        minval=-jnp.sqrt(3.0 * d), maxval=jnp.sqrt(3.0 * d))
    frequencies = jax.random.normal(k_freq, (N,), jnp.float32)
    phases = jnp.zeros((N,), jnp.float32)

    xs = jax.random.normal(k_x, (batch, d), jnp.float32)

    # Batched kernel vs per-sample pure-JAX reference.
    out = jax.block_until_ready(
        act_layer_batched(xs, betas, lambdas, frequencies, phases))
    ref = jax.block_until_ready(
        jax.vmap(lambda xx: act_layer_ref(xx, betas, lambdas, frequencies, phases))(xs))
    np.testing.assert_allclose(np.asarray(out), np.asarray(ref), rtol=1e-4, atol=1e-3)

    # Single-sample path (same signature as the PyTorch forward).
    out1 = jax.block_until_ready(
        act_layer(xs[0], betas, lambdas, frequencies, phases))
    np.testing.assert_allclose(np.asarray(out1), np.asarray(ref[0]), rtol=1e-4, atol=1e-3)

    print("KERNEL_OK")
</pallas_src>

<mosaic_0001>
module attributes {stable_mosaic.version = 11 : i64} {
  func.func @actlayer_kernel(%arg0: i32, %arg1: memref<8x128xf32, #tpu.memory_space<vmem>>, %arg2: memref<11x8x1xf32, #tpu.memory_space<vmem>>, %arg3: memref<8x128xf32, #tpu.memory_space<vmem>>) attributes {dimension_semantics = [#tpu.dimension_semantics<parallel>], iteration_bounds = array<i64: 1>, scalar_prefetch = 0 : i64, scratch_operands = 0 : i64, tpu.core_type = #tpu.core_type<tc>, window_params = [{transform_indices = @transform_0, window_bounds = array<i64: 8, 128>}, {pipeline_mode = #tpu.pipeline_mode<synchronous>, transform_indices = @transform_1, window_bounds = array<i64: 11, 8, 1>}, {transform_indices = @transform_2, window_bounds = array<i64: 8, 128>}]} {
    %c8 = arith.constant 8 : index
    %c0 = arith.constant 0 : index
    %c0_0 = arith.constant 0 : index
    %0 = vector.load %arg2[%c8, %c0, %c0_0] : memref<11x8x1xf32, #tpu.memory_space<vmem>>, vector<1x8x1xf32>
    %1 = vector.shape_cast %0 : vector<1x8x1xf32> to vector<8x1xf32>
    %c9 = arith.constant 9 : index
    %c0_1 = arith.constant 0 : index
    %c0_2 = arith.constant 0 : index
    %2 = vector.load %arg2[%c9, %c0_1, %c0_2] : memref<11x8x1xf32, #tpu.memory_space<vmem>>, vector<1x8x1xf32>
    %3 = vector.shape_cast %2 : vector<1x8x1xf32> to vector<8x1xf32>
    %c10 = arith.constant 10 : index
    %c0_3 = arith.constant 0 : index
    %c0_4 = arith.constant 0 : index
    %4 = vector.load %arg2[%c10, %c0_3, %c0_4] : memref<11x8x1xf32, #tpu.memory_space<vmem>>, vector<1x8x1xf32>
    %5 = vector.shape_cast %4 : vector<1x8x1xf32> to vector<8x1xf32>
    %cst = arith.constant 0.000000e+00 : f32
    %6 = vector.broadcast %cst : f32 to vector<8x128xf32>
    %c0_5 = arith.constant 0 : index
    %c0_6 = arith.constant 0 : index
    %7 = vector.load %arg1[%c0_5, %c0_6] : memref<8x128xf32, #tpu.memory_space<vmem>>, vector<1x128xf32>
    %c0_7 = arith.constant 0 : index
    %c0_8 = arith.constant 0 : index
    %c0_9 = arith.constant 0 : index
    %8 = vector.load %arg2[%c0_7, %c0_8, %c0_9] : memref<11x8x1xf32, #tpu.memory_space<vmem>>, vector<1x8x1xf32>
    %9 = vector.shape_cast %8 : vector<1x8x1xf32> to vector<8x1xf32>
    %10 = vector.broadcast %1 : vector<8x1xf32> to vector<8x128xf32>
    %11 = vector.broadcast %7 : vector<1x128xf32> to vector<8x128xf32>
    %12 = arith.mulf %10, %11 : vector<8x128xf32>
    %13 = vector.broadcast %3 : vector<8x1xf32> to vector<8x128xf32>
    %14 = arith.addf %12, %13 : vector<8x128xf32>
    %15 = math.sin %14 : vector<8x128xf32>
    %16 = vector.broadcast %9 : vector<8x1xf32> to vector<8x128xf32>
    %17 = arith.mulf %16, %15 : vector<8x128xf32>
    %18 = arith.addf %6, %17 : vector<8x128xf32>
    %c1 = arith.constant 1 : index
    %c0_10 = arith.constant 0 : index
    %19 = vector.load %arg1[%c1, %c0_10] : memref<8x128xf32, #tpu.memory_space<vmem>>, vector<1x128xf32>
    %c1_11 = arith.constant 1 : index
    %c0_12 = arith.constant 0 : index
    %c0_13 = arith.constant 0 : index
    %20 = vector.load %arg2[%c1_11, %c0_12, %c0_13] : memref<11x8x1xf32, #tpu.memory_space<vmem>>, vector<1x8x1xf32>
    %21 = vector.shape_cast %20 : vector<1x8x1xf32> to vector<8x1xf32>
    %22 = vector.broadcast %1 : vector<8x1xf32> to vector<8x128xf32>
    %23 = vector.broadcast %19 : vector<1x128xf32> to vector<8x128xf32>
    %24 = arith.mulf %22, %23 : vector<8x128xf32>
    %25 = vector.broadcast %3 : vector<8x1xf32> to vector<8x128xf32>
    %26 = arith.addf %24, %25 : vector<8x128xf32>
    %27 = math.sin %26 : vector<8x128xf32>
    %28 = vector.broadcast %21 : vector<8x1xf32> to vector<8x128xf32>
    %29 = arith.mulf %28, %27 : vector<8x128xf32>
    %30 = arith.addf %18, %29 : vector<8x128xf32>
    %c2 = arith.constant 2 : index
    %c0_14 = arith.constant 0 : index
    %31 = vector.load %arg1[%c2, %c0_14] : memref<8x128xf32, #tpu.memory_space<vmem>>, vector<1x128xf32>
    %c2_15 = arith.constant 2 : index
    %c0_16 = arith.constant 0 : index
    %c0_17 = arith.constant 0 : index
    %32 = vector.load %arg2[%c2_15, %c0_16, %c0_17] : memref<11x8x1xf32, #tpu.memory_space<vmem>>, vector<1x8x1xf32>
    %33 = vector.shape_cast %32 : vector<1x8x1xf32> to vector<8x1xf32>
    %34 = vector.broadcast %1 : vector<8x1xf32> to vector<8x128xf32>
    %35 = vector.broadcast %31 : vector<1x128xf32> to vector<8x128xf32>
    %36 = arith.mulf %34, %35 : vector<8x128xf32>
    %37 = vector.broadcast %3 : vector<8x1xf32> to vector<8x128xf32>
    %38 = arith.addf %36, %37 : vector<8x128xf32>
    %39 = math.sin %38 : vector<8x128xf32>
    %40 = vector.broadcast %33 : vector<8x1xf32> to vector<8x128xf32>
    %41 = arith.mulf %40, %39 : vector<8x128xf32>
    %42 = arith.addf %30, %41 : vector<8x128xf32>
    %c3 = arith.constant 3 : index
    %c0_18 = arith.constant 0 : index
    %43 = vector.load %arg1[%c3, %c0_18] : memref<8x128xf32, #tpu.memory_space<vmem>>, vector<1x128xf32>
    %c3_19 = arith.constant 3 : index
    %c0_20 = arith.constant 0 : index
    %c0_21 = arith.constant 0 : index
    %44 = vector.load %arg2[%c3_19, %c0_20, %c0_21] : memref<11x8x1xf32, #tpu.memory_space<vmem>>, vector<1x8x1xf32>
    %45 = vector.shape_cast %44 : vector<1x8x1xf32> to vector<8x1xf32>
    %46 = vector.broadcast %1 : vector<8x1xf32> to vector<8x128xf32>
    %47 = vector.broadcast %43 : vector<1x128xf32> to vector<8x128xf32>
    %48 = arith.mulf %46, %47 : vector<8x128xf32>
    %49 = vector.broadcast %3 : vector<8x1xf32> to vector<8x128xf32>
    %50 = arith.addf %48, %49 : vector<8x128xf32>
    %51 = math.sin %50 : vector<8x128xf32>
    %52 = vector.broadcast %45 : vector<8x1xf32> to vector<8x128xf32>
    %53 = arith.mulf %52, %51 : vector<8x128xf32>
    %54 = arith.addf %42, %53 : vector<8x128xf32>
    %c4 = arith.constant 4 : index
    %c0_22 = arith.constant 0 : index
    %55 = vector.load %arg1[%c4, %c0_22] : memref<8x128xf32, #tpu.memory_space<vmem>>, vector<1x128xf32>
    %c4_23 = arith.constant 4 : index
    %c0_24 = arith.constant 0 : index
    %c0_25 = arith.constant 0 : index
    %56 = vector.load %arg2[%c4_23, %c0_24, %c0_25] : memref<11x8x1xf32, #tpu.memory_space<vmem>>, vector<1x8x1xf32>
    %57 = vector.shape_cast %56 : vector<1x8x1xf32> to vector<8x1xf32>
    %58 = vector.broadcast %1 : vector<8x1xf32> to vector<8x128xf32>
    %59 = vector.broadcast %55 : vector<1x128xf32> to vector<8x128xf32>
    %60 = arith.mulf %58, %59 : vector<8x128xf32>
    %61 = vector.broadcast %3 : vector<8x1xf32> to vector<8x128xf32>
    %62 = arith.addf %60, %61 : vector<8x128xf32>
    %63 = math.sin %62 : vector<8x128xf32>
    %64 = vector.broadcast %57 : vector<8x1xf32> to vector<8x128xf32>
    %65 = arith.mulf %64, %63 : vector<8x128xf32>
    %66 = arith.addf %54, %65 : vector<8x128xf32>
    %c5 = arith.constant 5 : index
    %c0_26 = arith.constant 0 : index
    %67 = vector.load %arg1[%c5, %c0_26] : memref<8x128xf32, #tpu.memory_space<vmem>>, vector<1x128xf32>
    %c5_27 = arith.constant 5 : index
    %c0_28 = arith.constant 0 : index
    %c0_29 = arith.constant 0 : index
    %68 = vector.load %arg2[%c5_27, %c0_28, %c0_29] : memref<11x8x1xf32, #tpu.memory_space<vmem>>, vector<1x8x1xf32>
    %69 = vector.shape_cast %68 : vector<1x8x1xf32> to vector<8x1xf32>
    %70 = vector.broadcast %1 : vector<8x1xf32> to vector<8x128xf32>
    %71 = vector.broadcast %67 : vector<1x128xf32> to vector<8x128xf32>
    %72 = arith.mulf %70, %71 : vector<8x128xf32>
    %73 = vector.broadcast %3 : vector<8x1xf32> to vector<8x128xf32>
    %74 = arith.addf %72, %73 : vector<8x128xf32>
    %75 = math.sin %74 : vector<8x128xf32>
    %76 = vector.broadcast %69 : vector<8x1xf32> to vector<8x128xf32>
    %77 = arith.mulf %76, %75 : vector<8x128xf32>
    %78 = arith.addf %66, %77 : vector<8x128xf32>
    %c6 = arith.constant 6 : index
    %c0_30 = arith.constant 0 : index
    %79 = vector.load %arg1[%c6, %c0_30] : memref<8x128xf32, #tpu.memory_space<vmem>>, vector<1x128xf32>
    %c6_31 = arith.constant 6 : index
    %c0_32 = arith.constant 0 : index
    %c0_33 = arith.constant 0 : index
    %80 = vector.load %arg2[%c6_31, %c0_32, %c0_33] : memref<11x8x1xf32, #tpu.memory_space<vmem>>, vector<1x8x1xf32>
    %81 = vector.shape_cast %80 : vector<1x8x1xf32> to vector<8x1xf32>
    %82 = vector.broadcast %1 : vector<8x1xf32> to vector<8x128xf32>
    %83 = vector.broadcast %79 : vector<1x128xf32> to vector<8x128xf32>
    %84 = arith.mulf %82, %83 : vector<8x128xf32>
    %85 = vector.broadcast %3 : vector<8x1xf32> to vector<8x128xf32>
    %86 = arith.addf %84, %85 : vector<8x128xf32>
    %87 = math.sin %86 : vector<8x128xf32>
    %88 = vector.broadcast %81 : vector<8x1xf32> to vector<8x128xf32>
    %89 = arith.mulf %88, %87 : vector<8x128xf32>
    %90 = arith.addf %78, %89 : vector<8x128xf32>
    %c7 = arith.constant 7 : index
    %c0_34 = arith.constant 0 : index
    %91 = vector.load %arg1[%c7, %c0_34] : memref<8x128xf32, #tpu.memory_space<vmem>>, vector<1x128xf32>
    %c7_35 = arith.constant 7 : index
    %c0_36 = arith.constant 0 : index
    %c0_37 = arith.constant 0 : index
    %92 = vector.load %arg2[%c7_35, %c0_36, %c0_37] : memref<11x8x1xf32, #tpu.memory_space<vmem>>, vector<1x8x1xf32>
    %93 = vector.shape_cast %92 : vector<1x8x1xf32> to vector<8x1xf32>
    %94 = vector.broadcast %1 : vector<8x1xf32> to vector<8x128xf32>
    %95 = vector.broadcast %91 : vector<1x128xf32> to vector<8x128xf32>
    %96 = arith.mulf %94, %95 : vector<8x128xf32>
    %97 = vector.broadcast %3 : vector<8x1xf32> to vector<8x128xf32>
    %98 = arith.addf %96, %97 : vector<8x128xf32>
    %99 = math.sin %98 : vector<8x128xf32>
    %100 = vector.broadcast %93 : vector<8x1xf32> to vector<8x128xf32>
    %101 = arith.mulf %100, %99 : vector<8x128xf32>
    %102 = arith.addf %90, %101 : vector<8x128xf32>
    %103 = vector.broadcast %5 : vector<8x1xf32> to vector<8x128xf32>
    %104 = arith.subf %102, %103 : vector<8x128xf32>
    %c0_38 = arith.constant 0 : index
    %c0_39 = arith.constant 0 : index
    %105 = vector.load %arg3[%c0_38, %c0_39] : memref<8x128xf32, #tpu.memory_space<vmem>>, vector<8x128xf32>
    tpu.vector_store %arg3[%c0_38, %c0_39], %104 {strides = array<i32>} : memref<8x128xf32, #tpu.memory_space<vmem>>, vector<8x128xf32>,
    return
  }
  func.func @transform_0(%arg0: i32) -> (i32, i32) {
    %c0_i32 = arith.constant 0 : i32
    %c0_i32_0 = arith.constant 0 : i32
    return %c0_i32, %arg0 : i32, i32
  }
  func.func @transform_1(%arg0: i32) -> (i32, i32, i32) {
    %c0_i32 = arith.constant 0 : i32
    %c0_i32_0 = arith.constant 0 : i32
    %c0_i32_1 = arith.constant 0 : i32
    %c0_i32_2 = arith.constant 0 : i32
    return %c0_i32, %c0_i32_0, %c0_i32_1 : i32, i32, i32
  }
  func.func @transform_2(%arg0: i32) -> (i32, i32) {
    %c0_i32 = arith.constant 0 : i32
    %c0_i32_0 = arith.constant 0 : i32
    return %c0_i32, %arg0 : i32, i32
  }
}

</mosaic_0001>

<bundles_post_ra>
// kernel: tpu_custom_call.1
= control target key start
LH: loop header
LB: loop body
LE: loop exit
PB: predicated region body
PF: predicated region fallthrough
CT: control target
= control target key end

     0   :  { %v1156_v1 = vmov 0   ;;  %s2048_s0 = inlined_call_operand.vmem [shape: f32[8,128], index: 0, kind: input, shape index: {}]   ;;  %s2049_s1 = inlined_call_operand.vmem [shape: f32[11,8,1], index: 1, kind: input, shape index: {}]   ;;  %s2050_s2 = inlined_call_operand.hbm [shape: f32[8,128], index: 2, kind: output, shape index: {}]  }
   0x1   :  { %v1008_v0 = vld [vmem:[%s2049_s1 + $0x40] sm:$0xff]  ;;  %1098 = vset.pattern.permute.xlu0 %v1156_v1  ;;  %1099 = vset.pattern.permute.xlu1 %v1156_v1  ;;  %v1009_v3 = vld [vmem:[%s2049_s1 + $0x48] sm:$0xff] }
   0x2   :  { %22 = vperm.xlu0 %1098, %v1008_v0   ;;  %v19_v2 = vld [vmem:[%s2049_s1] sm:$0xff]  ;;  %v1016_v4 = vld [vmem:[%s2049_s1 + $0x8] sm:$0xff] }
   0x3   :  { %142 = vperm.xlu1 %1099, %v19_v2  }
   0x4   :  { %7 = vsyncpa [#allocation3], 0  ;;  %v1022_v5 = vld [vmem:[%s2049_s1 + $0x10] sm:$0xff]  ;;  %v1028_v6 = vld [vmem:[%s2049_s1 + $0x18] sm:$0xff]  ;;  %v2067_v30 = vmov 920167782  }
   0x5   :  { %v1034_v7 = vld [vmem:[%s2049_s1 + $0x20] sm:$0xff]  ;;  %v1040_v8 = vld [vmem:[%s2049_s1 + $0x28] sm:$0xff]  ;;  %v1046_v9 = vld [vmem:[%s2049_s1 + $0x30] sm:$0xff]  ;;  %v2058_v33 = vmov 1326507024  }
   0x6   :  { %32 = vperm.xlu0 %1098, %v1009_v3   ;;  %v1052_v10 = vld [vmem:[%s2049_s1 + $0x38] sm:$0xff]  ;;  %v1010_v11 = vld [vmem:[%s2049_s1 + $0x50] sm:$0xff]  ;;  %v1023_v13 = vld [vmem:[%s2048_s0 + $0x2] ss:$0 sm:$0xff]  ;;  %v2056_v37 = vmov 2102212464  }
   0x7   :  { %262 = vperm.xlu1 %1099, %v1016_v4   ;;  %v1035_v20 = vld [vmem:[%s2048_s0 + $0x4] ss:$0 sm:$0xff]  ;;  %v2061_v39 = vmov 2475754826   ;;  %v2063_v41 = vmov 2131351028  }
   0x8   :  { %v2065_v46 = vmov 683565275   ;;  %v1047_v51 = vld [vmem:[%s2048_s0 + $0x6] ss:$0 sm:$0xff]  ;;  %v1011_v52 = vld [vmem:[%s2048_s0] ss:$0 sm:$0xff] }
   0xa   :  { %382 = vperm.xlu0 %1098, %v1022_v5  }
   0xb   :  { %502 = vperm.xlu1 %1099, %v1028_v6  }
   0xe   :  { %622 = vperm.xlu0 %1098, %v1034_v7  }
   0xf   :  { %742 = vperm.xlu1 %1099, %v1040_v8  }
  0x12   :  { %862 = vperm.xlu0 %1098, %v1046_v9  }
  0x13   :  { %982 = vperm.xlu1 %1099, %v1052_v10  }
  0x16   :  { %989 = vperm.xlu0 %1098, %v1010_v11  }
  0x81   :  { %v1212_v12 = vpop.permute.xlu0 %22 }
  0x82   :  { %v274_v14 = vmul.f32 %v1023_v13, %v1212_v12  ;;  %v514_v22 = vmul.f32 %v1035_v20, %v1212_v12  ;;  %v754_v59 = vmul.f32 %v1047_v51, %v1212_v12  ;;  %v29_v60 = vmul.f32 %v1011_v52, %v1212_v12 }
  0x85   :  { %v1218_v15 = vpop.permute.xlu0 %32 }
  0x86   :  { %v1221_v16 = vadd.f32 %v274_v14, %v1218_v15  ;;  %v1229_v23 = vadd.f32 %v514_v22, %v1218_v15  ;;  %v1270_v62 = vadd.f32 %v754_v59, %v1218_v15  ;;  %v1273_v63 = vadd.f32 %v1218_v15, %v29_v60 }
  0x88   :  { %v279_v17 = vand.u32 2139095040, %v1221_v16  ;;  %v519_v24 = vand.u32 2139095040, %v1229_v23  ;;  %v276_v35 = vand.u32 2147483647, %v1221_v16  ;;  %v39_v7 = vand.u32 2139095040, %v1273_v63 }
  0x89   :  { %v759_v11 = vand.u32 2139095040, %v1270_v62  ;;  %v2055_v13 = vand.u32 2147483647, %v1229_v23 }
  0x8a   :  { %v280_v18 = vshrl.u32 %v279_v17, 23  ;;  %v520_v27 = vshrl.u32 %v519_v24, 23  ;;  %v283_v53 = vand.u32 8388607, %v276_v35  ;;  %v40_v20 = vshrl.u32 %v39_v7, 23 }
  0x8b   :  { %v760_v22 = vshrl.u32 %v759_v11, 23  ;;  %v523_v24 = vand.u32 8388607, %v2055_v13  ;;  %v2054_v11 = vand.u32 2147483647, %v1273_v63 }
  0x8c   :  { %v1024_v19 = vadd.s32 4294967169, %v280_v18  ;;  %v1036_v29 = vadd.s32 4294967169, %v520_v27  ;;  %v284_v0 = vor.u32 8388608, %v283_v53 }
  0x8e   :  { %v286_v21 = vadd.s32 1, %v1024_v19  ;;  %v526_v32 = vadd.s32 1, %v1036_v29  ;;  %v324_v9 = vshll.u32 %v284_v0, 8 }
  0x90   :  { %vm287_vm0 = vcmp.gt.s32.totalorder %v286_v21, 0  ;;  %vm527_vm1 = vcmp.gt.s32.totalorder %v526_v32, 0 }
  0x91   :  { %v288_v25 = vsel %vm287_vm0, %v286_v21, 0  ;;  %v528_v58 = vsel %vm527_vm1, %v526_v32, 0 }
  0x92   :  { %v290_v26 = vand.u32 31, %v288_v25  ;;  %v1239_v36 = vshrl.u32 %v288_v25, 5  ;;  %v530_v3 = vand.u32 31, %v528_v58  ;;  %v1301_v25 = vshrl.u32 %v528_v58, 5 }
  0x93   :  { %v524_v58 = vor.u32 8388608, %v523_v24 }
  0x94   :  { %v1232_v28 = vsub.s32 32, %v290_v26  ;;  %v302_v38 = vshll.u32 %v2056_v37, %v290_v26  ;;  %v305_v44 = vshll.u32 %v2067_v30, %v290_v26  ;;  %v293_v47 = vshll.u32 %v2065_v46, %v290_v26 }
  0x95   :  { %v296_v48 = vshll.u32 %v2061_v39, %v290_v26  ;;  %v299_v49 = vshll.u32 %v2063_v41, %v290_v26  ;;  %vm311_vm2 = vcmp.lt.s32.totalorder %v1239_v36, 4  ;;  %vm308_vm3 = vcmp.lt.s32.totalorder %v1239_v36, 1 }
  0x96   :  { %v303_v31 = vshrl.u32 %v2067_v30, %v1232_v28  ;;  %v306_v34 = vshrl.u32 %v2058_v33, %v1232_v28  ;;  %v294_v40 = vshrl.u32 %v2061_v39, %v1232_v28  ;;  %v297_v42 = vshrl.u32 %v2063_v41, %v1232_v28 }
  0x97   :  { %v300_v43 = vshrl.u32 %v2056_v37, %v1232_v28  ;;  %vm310_vm4 = vcmp.lt.s32.totalorder %v1239_v36, 3  ;;  %vm309_vm5 = vcmp.lt.s32.totalorder %v1239_v36, 2  ;;  %v531_v10 = vsub.s32 32, %v530_v3 }
  0x98   :  { %v304_v45 = vor.u32 %v303_v31, %v302_v38  ;;  %v307_v50 = vor.u32 %v306_v34, %v305_v44  ;;  %v295_v54 = vor.u32 %v294_v40, %v293_v47  ;;  %v298_v55 = vor.u32 %v297_v42, %v296_v48 }
  0x99   :  { %v301_v56 = vor.u32 %v300_v43, %v299_v49  ;;  %v543_v21 = vshrl.u32 %v2067_v30, %v531_v10  ;;  %v546_v26 = vshrl.u32 %v2058_v33, %v531_v10  ;;  %v534_v29 = vshrl.u32 %v2061_v39, %v531_v10 }
  0x9a   :  { %v317_v57 = vsel %vm311_vm2, %v304_v45, 920167782  ;;  %v321_v61 = vsel %vm311_vm2, %v307_v50, 1326507024  ;;  %v316_v1 = vsel %vm308_vm3, %v295_v54, %v298_v55  ;;  %v537_v31 = vshrl.u32 %v2063_v41, %v531_v10 }
  0x9b   :  { %v318_v2 = vsel %vm310_vm4, %v301_v56, %v317_v57  ;;  %v320_v4 = vsel %vm308_vm3, %v298_v55, %v301_v56  ;;  %v322_v5 = vsel %vm310_vm4, %v304_v45, %v321_v61  ;;  %v313_v27 = vsel %vm311_vm2, %v301_v56, 2102212464 }
  0x9c   :  { %v319_v6 = vsel %vm309_vm5, %v316_v1, %v318_v2  ;;  %v323_v8 = vsel %vm309_vm5, %v320_v4, %v322_v5  ;;  %v542_v32 = vshll.u32 %v2056_v37, %v530_v3  ;;  %v292_v34 = vshrl.u32 %v2065_v46, %v1232_v28 }
  0x9d   :  { %v1291_v14 = vmul.u32.u64.low %v324_v9, %v319_v6  ;;  %v1292_v17 = vmul.u32.u64.high %v324_v9, %v319_v6, %v1291_v14  ;;  %v1295_v18 = vmul.u32.u64.low %v324_v9, %v323_v8  ;;  %v1296_v19 = vmul.u32.u64.high %v324_v9, %v323_v8, %v1295_v18 }
  0x9e   :  { %v540_v38 = vshrl.u32 %v2056_v37, %v531_v10  ;;  %v545_v40 = vshll.u32 %v2067_v30, %v530_v3  ;;  %v1012_v42 = vadd.s32 4294967169, %v40_v20  ;;  %v533_v43 = vshll.u32 %v2065_v46, %v530_v3 }
  0x9f   :  { %v536_v44 = vshll.u32 %v2061_v39, %v530_v3  ;;  %v544_v45 = vor.u32 %v543_v21, %v542_v32  ;;  %v1048_v47 = vadd.s32 4294967169, %v760_v22  ;;  %v312_v48 = vsel %vm308_vm3, %v292_v34, %v295_v54  ;;  %v1017_v21 = vld [vmem:[%s2048_s0 + $0x1] ss:$0 sm:$0xff] }
  0xa0   :  { %v314_v49 = vsel %vm310_vm4, %v298_v55, %v313_v27  ;;  %v539_v50 = vshll.u32 %v2063_v41, %v530_v3  ;;  %v547_v28 = vor.u32 %v546_v26, %v545_v40  ;;  %v334_v51 = vadd.s32 1, %v1292_v17 }
  0xa1   :  { %v535_v52 = vor.u32 %v534_v29, %v533_v43  ;;  %v538_v53 = vor.u32 %v537_v31, %v536_v44  ;;  %vm333_vm6 = vc.u32 %v1296_v19, %v1291_v14  ;;  %vm551_vm7 = vcmp.lt.s32.totalorder %v1301_v25, 4 }
  0xa2   :  { %v541_v56 = vor.u32 %v540_v38, %v539_v50  ;;  %v46_v57 = vadd.s32 1, %v1012_v42  ;;  %v315_v54 = vsel %vm309_vm5, %v312_v48, %v314_v49  ;;  %v557_v55 = vsel %vm551_vm7, %v544_v45, 920167782 }
  0xa3   :  { %v561_v59 = vsel %vm551_vm7, %v547_v28, 1326507024  ;;  %v766_v60 = vadd.s32 1, %v1048_v47  ;;  %v335_v61 = vsel %vm333_vm6, %v334_v51, %v1292_v17  ;;  %vm548_vm8 = vcmp.lt.s32.totalorder %v1301_v25, 1 }
  0xa4   :  { %vm550_vm9 = vcmp.lt.s32.totalorder %v1301_v25, 3  ;;  %vm47_vm10 = vcmp.gt.s32.totalorder %v46_v57, 0  ;;  %v331_v0 = vmul.u32 %v324_v9, %v315_v54  ;;  %v556_v36 = vsel %vm548_vm8, %v535_v52, %v538_v53 }
  0xa5   :  { %v558_v1 = vsel %vm550_vm9, %v541_v56, %v557_v55  ;;  %v48_v2 = vsel %vm47_vm10, %v46_v57, 0  ;;  %v560_v3 = vsel %vm548_vm8, %v538_v53, %v541_v56  ;;  %v562_v4 = vsel %vm550_vm9, %v544_v45, %v561_v59 }
  0xa6   :  { %v50_v5 = vand.u32 31, %v48_v2  ;;  %v1341_v6 = vadd.s32 %v335_v61, %v331_v0  ;;  %vm549_vm11 = vcmp.lt.s32.totalorder %v1301_v25, 2  ;;  %vm767_vm12 = vcmp.gt.s32.totalorder %v766_v60, 0 }
  0xa7   :  { %v559_v7 = vsel %vm549_vm11, %v556_v36, %v558_v1  ;;  %v563_v8 = vsel %vm549_vm11, %v560_v3, %v562_v4  ;;  %v1348_v9 = vshll.u32 %v524_v58, 8  ;;  %v532_v18 = vshrl.u32 %v2065_v46, %v531_v10 }
  0xa8   :  { %v1351_v17 = vsub.s32 32, %v50_v5  ;;  %v768_v20 = vsel %vm767_vm12, %v766_v60, 0  ;;  %v337_v22 = vadd.s32 536870912, %v1341_v6  ;;  %v553_v24 = vsel %vm551_vm7, %v541_v56, 2102212464 }
  0xa9   :  { %v1361_v26 = vmul.u32.u64.low %v1348_v9, %v559_v7  ;;  %v1362_v27 = vmul.u32.u64.high %v1348_v9, %v559_v7, %v1361_v26  ;;  %v1366_v29 = vmul.u32.u64.low %v1348_v9, %v563_v8  ;;  %v1367_v31 = vmul.u32.u64.high %v1348_v9, %v563_v8, %v1366_v29 }
  0xaa   :  { %v54_v10 = vshrl.u32 %v2061_v39, %v1351_v17  ;;  %v57_v32 = vshrl.u32 %v2063_v41, %v1351_v17  ;;  %v552_v34 = vsel %vm548_vm8, %v532_v18, %v535_v52  ;;  %v770_v38 = vand.u32 31, %v768_v20 }
  0xab   :  { %v43_v40 = vand.u32 8388607, %v2054_v11  ;;  %v154_v42 = vmul.f32 %v1017_v21, %v1212_v12  ;;  %v554_v43 = vsel %vm550_vm9, %v538_v53, %v553_v24  ;;  %v53_v44 = vshll.u32 %v2065_v46, %v50_v5 }
  0xac   :  { %v56_v45 = vshll.u32 %v2061_v39, %v50_v5  ;;  %v60_v47 = vshrl.u32 %v2056_v37, %v1351_v17  ;;  %v1384_v48 = vshrl.u32 %v337_v22, 30  ;;  %v1386_v49 = vshrl.u32 %v48_v2, 5 }
  0xad   :  { %v62_v50 = vshll.u32 %v2056_v37, %v50_v5  ;;  %v63_v28 = vshrl.u32 %v2067_v30, %v1351_v17  ;;  %v1391_v51 = vor.u32 %v54_v10, %v53_v44  ;;  %v59_v53 = vshll.u32 %v2063_v41, %v50_v5 }
  0xae   :  { %v1393_v52 = vor.u32 %v57_v32, %v56_v45  ;;  %v66_v56 = vshrl.u32 %v2058_v33, %v1351_v17  ;;  %v2051_v57 = vand.u32 2147483647, %v1270_v62  ;;  %v1399_v54 = vsub.s32 32, %v770_v38 }
  0xaf   :  { %v64_v55 = vor.u32 %v63_v28, %v62_v50  ;;  %v1402_v58 = vadd.f32 %v154_v42, %v1218_v15  ;;  %v555_v59 = vsel %vm549_vm11, %v552_v34, %v554_v43  ;;  %v1406_v60 = vshrl.u32 %v768_v20, 5 }
  0xb0   :  { %v61_v61 = vor.u32 %v60_v47, %v59_v53  ;;  %v65_v0 = vshll.u32 %v2067_v30, %v50_v5  ;;  %v339_v36 = vshll.u32 %v1384_v48, 30  ;;  %v574_v1 = vadd.s32 1, %v1362_v27 }
  0xb1   :  { %v44_v2 = vor.u32 8388608, %v43_v40  ;;  %vm68_vm13 = vcmp.lt.s32.totalorder %v1386_v49, 1  ;;  %vm573_vm14 = vc.u32 %v1367_v31, %v1361_v26  ;;  %vm71_vm15 = vcmp.lt.s32.totalorder %v1386_v49, 4 }
  0xb2   :  { %v67_v3 = vor.u32 %v66_v56, %v65_v0  ;;  %v76_v25 = vsel %vm68_vm13, %v1391_v51, %v1393_v52  ;;  %v776_v4 = vshll.u32 %v2061_v39, %v770_v38  ;;  %v786_v5 = vshrl.u32 %v2058_v33, %v1399_v54 }
  0xb3   :  { %vm70_vm0 = vcmp.lt.s32.totalorder %v1386_v49, 3  ;;  %v77_v7 = vsel %vm71_vm15, %v64_v55, 920167782  ;;  %v777_v8 = vshrl.u32 %v2063_v41, %v1399_v54  ;;  %v783_v18 = vshrl.u32 %v2067_v30, %v1399_v54 }
  0xb4   :  { %vm69_vm1 = vcmp.lt.s32.totalorder %v1386_v49, 2  ;;  %v78_v20 = vsel %vm70_vm0, %v61_v61, %v77_v7  ;;  %v780_v21 = vshrl.u32 %v2056_v37, %v1399_v54  ;;  %v785_v22 = vshll.u32 %v2067_v30, %v770_v38 }
  0xb5   :  { %v79_v24 = vsel %vm69_vm1, %v76_v25, %v78_v20  ;;  %v84_v29 = vshll.u32 %v44_v2, 8  ;;  %v774_v10 = vshrl.u32 %v2061_v39, %v1399_v54  ;;  %v782_v32 = vshll.u32 %v2056_v37, %v770_v38 }
  0xb6   :  { %v80_v34 = vsel %vm68_vm13, %v1393_v52, %v61_v61  ;;  %v81_v40 = vsel %vm71_vm15, %v67_v3, 1326507024  ;;  %v779_v42 = vshll.u32 %v2063_v41, %v770_v38  ;;  %v787_v43 = vor.u32 %v786_v5, %v785_v22 }
  0xb7   :  { %v1446_v44 = vmul.u32.u64.low %v84_v29, %v79_v24  ;;  %v1447_v45 = vmul.u32.u64.high %v84_v29, %v79_v24, %v1446_v44  ;;  %v571_v47 = vmul.u32 %v1348_v9, %v555_v59  ;;  %v763_v50 = vand.u32 8388607, %v2051_v57 }
  0xb8   :  { %v784_v28 = vor.u32 %v783_v18, %v782_v32  ;;  %v82_v53 = vsel %vm70_vm0, %v64_v55, %v81_v40  ;;  %v773_v56 = vshll.u32 %v2065_v46, %v770_v38  ;;  %v778_v0 = vor.u32 %v777_v8, %v776_v4 }
  0xb9   :  { %v781_v2 = vor.u32 %v780_v21, %v779_v42  ;;  %v83_v3 = vsel %vm69_vm1, %v80_v34, %v82_v53  ;;  %v575_v25 = vsel %vm573_vm14, %v574_v1, %v1362_v27  ;;  %vm791_vm2 = vcmp.lt.s32.totalorder %v1406_v60, 4 }
  0xba   :  { %v1463_v9 = vmul.u32.u64.low %v84_v29, %v83_v3  ;;  %v1464_v59 = vmul.u32.u64.high %v84_v29, %v83_v3, %v1463_v9  ;;  %v1467_v5 = vsub.s32 %v1341_v6, %v339_v36  ;;  %v775_v55 = vor.u32 %v774_v10, %v773_v56 }
  0xbb   :  { %v801_v38 = vsel %vm791_vm2, %v787_v43, 1326507024  ;;  %v73_v4 = vsel %vm71_vm15, %v61_v61, 2102212464  ;;  %vm788_vm3 = vcmp.lt.s32.totalorder %v1406_v60, 1  ;;  %v52_v1 = vshrl.u32 %v2065_v46, %v1351_v17 }
  0xbc   :  { %v797_v27 = vsel %vm791_vm2, %v784_v28, 920167782  ;;  %v159_v7 = vand.u32 2139095040, %v1402_v58  ;;  %v576_v8 = vadd.s32 %v575_v25, %v571_v47  ;;  %v764_v6 = vor.u32 8388608, %v763_v50  ;;  %v1029_v47 = vld [vmem:[%s2048_s0 + $0x3] ss:$0 sm:$0xff] }
  0xbd   :  { %vm790_vm4 = vcmp.lt.s32.totalorder %v1406_v60, 3  ;;  %v800_v36 = vsel %vm788_vm3, %v778_v0, %v781_v2  ;;  %v72_v18 = vsel %vm68_vm13, %v52_v1, %v1391_v51  ;;  %v74_v17 = vsel %vm70_vm0, %v1393_v52, %v73_v4 }
  0xbe   :  { %v802_v61 = vsel %vm790_vm4, %v784_v28, %v801_v38  ;;  %v160_v20 = vshrl.u32 %v159_v7, 23  ;;  %v342_v21 = vsub.s32 0, %v1467_v5  ;;  %v796_v22 = vsel %vm788_vm3, %v775_v55, %v778_v0 }
  0xbf   :  { %v798_v24 = vsel %vm790_vm4, %v781_v2, %v797_v27  ;;  %v94_v10 = vadd.s32 1, %v1447_v45  ;;  %vm789_vm5 = vcmp.lt.s32.totalorder %v1406_v60, 2  ;;  %vm93_vm6 = vc.u32 %v1464_v59, %v1446_v44 }
  0xc0   :  { %v1018_v51 = vadd.s32 4294967169, %v160_v20  ;;  %v803_v52 = vsel %vm789_vm5, %v800_v36, %v802_v61  ;;  %v75_v32 = vsel %vm69_vm1, %v72_v18, %v74_v17  ;;  %v577_v34 = vadd.s32 536870912, %v576_v8 }
  0xc1   :  { %v799_v40 = vsel %vm789_vm5, %v796_v22, %v798_v24  ;;  %v1505_v42 = vshll.u32 %v764_v6, 8  ;;  %v1025_v50 = vmin.u32 %v342_v21, %v1467_v5  ;;  %v95_v28 = vsel %vm93_vm6, %v94_v10, %v1447_v45 }
  0xc2   :  { %v166_v43 = vadd.s32 1, %v1018_v51  ;;  %v91_v49 = vmul.u32 %v84_v29, %v75_v32  ;;  %v394_v38 = vmul.f32 %v1029_v47, %v1212_v12  ;;  %v1522_v4 = vshrl.u32 %v577_v34, 30 }
  0xc3   :  { %v1513_v53 = vmul.u32.u64.low %v1505_v42, %v803_v52  ;;  %v1514_v56 = vmul.u32.u64.high %v1505_v42, %v803_v52, %v1513_v53  ;;  %v1517_v3 = vmul.u32.u64.low %v1505_v42, %v799_v40  ;;  %v1518_v25 = vmul.u32.u64.high %v1505_v42, %v799_v40, %v1517_v3 }
  0xc4   :  { %vm167_vm7 = vcmp.gt.s32.totalorder %v166_v43, 0  ;;  %v793_v27 = vsel %vm791_vm2, %v781_v2, 2102212464  ;;  %v96_v45 = vadd.s32 %v95_v28, %v91_v49  ;;  %v344_v1 = vclz %v1025_v50 }
  0xc5   :  { %v168_v9 = vsel %vm167_vm7, %v166_v43, 0  ;;  %v772_v7 = vshrl.u32 %v2065_v46, %v1399_v54  ;;  %v1529_v6 = vadd.f32 %v394_v38, %v1218_v15  ;;  %v794_v61 = vsel %vm790_vm4, %v778_v0, %v793_v27 }
  0xc6   :  { %v170_v29 = vand.u32 31, %v168_v9  ;;  %v2053_v18 = vand.u32 2147483647, %v1402_v58  ;;  %v579_v2 = vshll.u32 %v1522_v4, 30  ;;  %v97_v20 = vadd.s32 536870912, %v96_v45 }
  0xc7   :  { %v792_v36 = vsel %vm788_vm3, %v772_v7, %v775_v55  ;;  %v1537_v21 = vadd.s32 4294967294, %v344_v1  ;;  %v399_v24 = vand.u32 2139095040, %v1529_v6  ;;  %vm813_vm8 = vc.u32 %v1514_v56, %v1517_v3 }
  0xc8   :  { %v171_v17 = vsub.s32 32, %v170_v29  ;;  %v795_v55 = vsel %vm789_vm5, %v792_v36, %v794_v61  ;;  %v173_v10 = vshll.u32 %v2065_v46, %v170_v29  ;;  %v176_v0 = vshll.u32 %v2061_v39, %v170_v29 }
  0xc9   :  { %v814_v52 = vadd.s32 1, %v1518_v25  ;;  %v163_v32 = vand.u32 8388607, %v2053_v18  ;;  %v169_v34 = vshrl.u32 %v168_v9, 5  ;;  %v1552_v40 = vshrl.u32 %v97_v20, 30 }
  0xca   :  { %v174_v54 = vshrl.u32 %v2061_v39, %v171_v17  ;;  %v177_v22 = vshrl.u32 %v2063_v41, %v171_v17  ;;  %v180_v51 = vshrl.u32 %v2056_v37, %v171_v17  ;;  %v179_v47 = vshll.u32 %v2063_v41, %v170_v29 }
  0xcb   :  { %v1555_v50 = vsub.s32 %v576_v8, %v579_v2  ;;  %v182_v28 = vshll.u32 %v2056_v37, %v170_v29  ;;  %v183_v53 = vshrl.u32 %v2067_v30, %v171_v17  ;;  %v400_v49 = vshrl.u32 %v399_v24, 23 }
  0xcc   :  { %v175_v43 = vor.u32 %v174_v54, %v173_v10  ;;  %v178_v60 = vor.u32 %v177_v22, %v176_v0  ;;  %v811_v38 = vmul.u32 %v1505_v42, %v795_v55  ;;  %v181_v27 = vor.u32 %v180_v51, %v179_v47 }
  0xcd   :  { %v185_v1 = vshll.u32 %v2067_v30, %v170_v29  ;;  %v186_v9 = vshrl.u32 %v2058_v33, %v171_v17  ;;  %v815_v7 = vsel %vm813_vm8, %v814_v52, %v1518_v25  ;;  %v164_v36 = vor.u32 8388608, %v163_v32  ;;  %v1041_v52 = vld [vmem:[%s2048_s0 + $0x5] ss:$0 sm:$0xff] }
  0xce   :  { %v184_v8 = vor.u32 %v183_v53, %v182_v28  ;;  %vm188_vm9 = vcmp.lt.s32.totalorder %v169_v34, 1  ;;  %v99_v61 = vshll.u32 %v1552_v40, 30  ;;  %vm191_vm10 = vcmp.lt.s32.totalorder %v169_v34, 4 }
  0xcf   :  { %v187_v2 = vor.u32 %v186_v9, %v185_v1  ;;  %v196_v20 = vsel %vm188_vm9, %v175_v43, %v178_v60  ;;  %vm189_vm11 = vcmp.lt.s32.totalorder %v169_v34, 2  ;;  %vm190_vm12 = vcmp.lt.s32.totalorder %v169_v34, 3 }
  0xd0   :  { %v197_v42 = vsel %vm191_vm10, %v184_v8, 920167782  ;;  %v1030_v29 = vadd.s32 4294967169, %v400_v49  ;;  %v172_v54 = vshrl.u32 %v2065_v46, %v171_v17  ;;  %v193_v22 = vsel %vm191_vm10, %v181_v27, 2102212464 }
  0xd1   :  { %v198_v24 = vsel %vm190_vm12, %v181_v27, %v197_v42  ;;  %v200_v25 = vsel %vm188_vm9, %v178_v60, %v181_v27  ;;  %v1571_v55 = vadd.s32 %v815_v7, %v811_v38  ;;  %v201_v0 = vsel %vm191_vm10, %v187_v2, 1326507024 }
  0xd2   :  { %v199_v10 = vsel %vm189_vm11, %v196_v20, %v198_v24  ;;  %v204_v51 = vshll.u32 %v164_v36, 8  ;;  %v1577_v32 = vsub.s32 %v96_v45, %v99_v61  ;;  %v192_v47 = vsel %vm188_vm9, %v172_v54, %v175_v43 }
  0xd3   :  { %v202_v17 = vsel %vm190_vm12, %v184_v8, %v201_v0  ;;  %v406_v28 = vadd.s32 1, %v1030_v29  ;;  %v194_v53 = vsel %vm190_vm12, %v178_v60, %v193_v22  ;;  %vm1027_vm13 = vcmp.lt.s32.totalorder %v1537_v21, 0 }
  0xd4   :  { %v203_v49 = vsel %vm189_vm11, %v200_v25, %v202_v17  ;;  %v1583_v38 = vmul.u32.u64.low %v204_v51, %v199_v10  ;;  %v1584_v27 = vmul.u32.u64.high %v204_v51, %v199_v10, %v1583_v38  ;;  %v634_v1 = vmul.f32 %v1041_v52, %v1212_v12 }
  0xd5   :  { %vm407_vm14 = vcmp.gt.s32.totalorder %v406_v28, 0  ;;  %v582_v45 = vsub.s32 0, %v1555_v50  ;;  %v1590_v9 = vmul.u32.u64.low %v204_v51, %v203_v49  ;;  %v1591_v43 = vmul.u32.u64.high %v204_v51, %v203_v49, %v1590_v9 }
  0xd6   :  { %v408_v7 = vsel %vm407_vm14, %v406_v28, 0  ;;  %v817_v36 = vadd.s32 536870912, %v1571_v55  ;;  %v102_v60 = vsub.s32 0, %v1577_v32  ;;  %v195_v8 = vsel %vm189_vm11, %v192_v47, %v194_v53 }
  0xd7   :  { %v2052_v61 = vand.u32 2147483647, %v1529_v6  ;;  %v214_v2 = vadd.s32 1, %v1584_v27  ;;  %v410_v20 = vand.u32 31, %v408_v7  ;;  %v1599_v42 = vsel %vm1027_vm13, 0, %v1537_v21 }
  0xd8   :  { %v1602_v29 = vadd.f32 %v634_v1, %v1218_v15  ;;  %v1037_v54 = vmin.u32 %v582_v45, %v1555_v50  ;;  %v211_v22 = vmul.u32 %v204_v51, %v195_v8  ;;  %vm213_vm15 = vc.u32 %v1591_v43, %v1583_v38 }
  0xd9   :  { %v411_v24 = vsub.s32 32, %v410_v20  ;;  %v1607_v34 = vshrl.u32 %v817_v36, 30  ;;  %v1013_v25 = vmin.u32 %v102_v60, %v1577_v32  ;;  %v215_v10 = vsel %vm213_vm15, %v214_v2, %v1584_v27 }
  0xda   :  { %2072 = vst [vmem:[#allocation5_spill] sm:$0xff] %v1602_v29  ;;  %v403_v21 = vand.u32 8388607, %v2052_v61  ;;  %v216_v0 = vadd.s32 %v215_v10, %v211_v22  ;;  %v409_v52 = vshrl.u32 %v408_v7, 5  ;;  %v413_v47 = vshll.u32 %v2065_v46, %v410_v20 }
  0xdb   :  { %v414_v17 = vshrl.u32 %v2061_v39, %v411_v24  ;;  %v416_v51 = vshll.u32 %v2061_v39, %v410_v20  ;;  %v417_v28 = vshrl.u32 %v2063_v41, %v411_v24  ;;  %v419_v53 = vshll.u32 %v2063_v41, %v410_v20 }
  0xdc   :  { %v420_v49 = vshrl.u32 %v2056_v37, %v411_v24  ;;  %v352_v1 = vsub.s32 4294967266, %v1599_v42  ;;  %v217_v27 = vadd.s32 536870912, %v216_v0  ;;  %v422_v45 = vshll.u32 %v2056_v37, %v410_v20 }
  0xdd   :  { %v423_v9 = vshrl.u32 %v2067_v30, %v411_v24  ;;  %v584_v7 = vclz %v1037_v54  ;;  %v415_v36 = vor.u32 %v414_v17, %v413_v47  ;;  %v418_v60 = vor.u32 %v417_v28, %v416_v51 }
  0xde   :  { %v421_v8 = vor.u32 %v420_v49, %v419_v53  ;;  %v1622_v2 = vshrl.u32 %v217_v27, 30  ;;  %v425_v10 = vshll.u32 %v2067_v30, %v410_v20  ;;  %v426_v57 = vshrl.u32 %v2058_v33, %v411_v24 }
  0xdf   :  { %v424_v22 = vor.u32 %v423_v9, %v422_v45  ;;  %v819_v61 = vshll.u32 %v1607_v34, 30  ;;  %v104_v18 = vclz %v1013_v25  ;;  %v404_v11 = vor.u32 8388608, %v403_v21 }
  0xe0   :  { %vm428_vm0 = vcmp.lt.s32.totalorder %v409_v52, 1  ;;  %v219_v13 = vshll.u32 %v1622_v2, 30  ;;  %v427_v37 = vor.u32 %v426_v57, %v425_v10  ;;  %vm429_vm1 = vcmp.lt.s32.totalorder %v409_v52, 2 }
  0xe1   :  { %vm431_vm2 = vcmp.lt.s32.totalorder %v409_v52, 4  ;;  %vm430_vm3 = vcmp.lt.s32.totalorder %v409_v52, 3  ;;  %v436_v47 = vsel %vm428_vm0, %v415_v36, %v418_v60  ;;  %v412_v20 = vshrl.u32 %v2065_v46, %v411_v24 }
  0xe2   :  { %v433_v54 = vsel %vm431_vm2, %v421_v8, 2102212464  ;;  %v437_v17 = vsel %vm431_vm2, %v424_v22, 920167782  ;;  %v1629_v51 = vsub.s32 %v216_v0, %v219_v13  ;;  %v440_v53 = vsel %vm428_vm0, %v418_v60, %v421_v8 }
  0xe3   :  { %v438_v28 = vsel %vm430_vm3, %v421_v8, %v437_v17  ;;  %v1634_v25 = vsub.s32 %v1571_v55, %v819_v61  ;;  %v441_v57 = vsel %vm431_vm2, %v427_v37, 1326507024  ;;  %v444_v49 = vshll.u32 %v404_v11, 8 }
  0xe4   :  { %v439_v21 = vsel %vm429_vm1, %v436_v47, %v438_v28  ;;  %v1014_v27 = vadd.s32 4294967294, %v104_v18  ;;  %v432_v45 = vsel %vm428_vm0, %v412_v20, %v415_v36  ;;  %v434_v9 = vsel %vm430_vm3, %v418_v60, %v433_v54 }
  0xe5   :  { %v442_v10 = vsel %vm430_vm3, %v424_v22, %v441_v57  ;;  %v1639_v0 = vmul.u32.u64.low %v444_v49, %v439_v21  ;;  %v1640_v33 = vmul.u32.u64.high %v444_v49, %v439_v21, %v1639_v0  ;;  %v1038_v24 = vadd.s32 4294967294, %v584_v7 }
  0xe6   :  { %v443_v13 = vsel %vm429_vm1, %v440_v53, %v442_v10  ;;  %v222_v8 = vsub.s32 0, %v1629_v51  ;;  %v348_v37 = vsub.s32 32, %v1599_v42  ;;  %v435_v11 = vsel %vm429_vm1, %v432_v45, %v434_v9 }
  0xe7   :  { %v1644_v55 = vmul.u32.u64.low %v444_v49, %v443_v13  ;;  %v1645_v61 = vmul.u32.u64.high %v444_v49, %v443_v13, %v1644_v55  ;;  %v639_v18 = vand.u32 2139095040, %v1602_v29  ;;  %vm278_vm4 = vcmp.lt.s32.totalorder %v1221_v16, 0 }
  0xe8   :  { %v353_v36 = vadd.s32 127, %v352_v1  ;;  %v822_v60 = vsub.s32 0, %v1634_v25  ;;  %vm1015_vm5 = vcmp.lt.s32.totalorder %v1014_v27, 0  ;;  %v332_v7 = vadd.s32 %v1291_v14, %v1296_v19 }
  0xe9   :  { %v362_v22 = vsub.s32 4, %v1384_v48  ;;  %v454_v54 = vadd.s32 1, %v1640_v33  ;;  %v640_v47 = vshrl.u32 %v639_v18, 23  ;;  %vm1039_vm6 = vcmp.lt.s32.totalorder %v1038_v24, 0 }
  0xea   :  { %v1019_v52 = vmin.u32 %v222_v8, %v1629_v51  ;;  %v451_v17 = vmul.u32 %v444_v49, %v435_v11  ;;  %vm453_vm7 = vc.u32 %v1645_v61, %v1639_v0  ;;  %v350_v20 = vshrl.u32 %v332_v7, %v348_v37 }
  0xeb   :  { %v1659_v1 = vsel %vm1015_vm5, 0, %v1014_v27  ;;  %v455_v28 = vsel %vm453_vm7, %v454_v54, %v1640_v33  ;;  %v1042_v53 = vadd.s32 4294967169, %v640_v47  ;;  %v354_v21 = vshll.u32 %v353_v36, 23 }
  0xec   :  { %vm518_vm8 = vcmp.lt.s32.totalorder %v1229_v23, 0  ;;  %v1049_v14 = vmin.u32 %v822_v60, %v1634_v25  ;;  %v456_v19 = vadd.s32 %v455_v28, %v451_v17  ;;  %vm1666_vm9 = vcmp.le.f32.partialorder %v276_v35, 0.7853982 }
  0xed   :  { %v349_v49 = vshll.u32 %v1467_v5, %v1599_v42  ;;  %v1672_v27 = vsel %vm1039_vm6, 0, %v1038_v24  ;;  %v646_v45 = vadd.s32 1, %v1042_v53  ;;  %v1677_v33 = vsel %vm278_vm4, %v362_v22, %v1384_v48 }
  0xee   :  { %v602_v9 = vsub.s32 4, %v1522_v4  ;;  %v112_v10 = vsub.s32 4294967266, %v1659_v1  ;;  %v224_v13 = vclz %v1019_v52  ;;  %v457_v8 = vadd.s32 536870912, %v456_v19 }
  0xef   :  { %v1681_v35 = vor.u32 %v350_v20, %v349_v49  ;;  %v2060_v55 = vand.u32 2147483647, %v1602_v29  ;;  %vm647_vm10 = vcmp.gt.s32.totalorder %v646_v45, 0  ;;  %v1684_v5 = vor.u32 4788187, %v354_v21 }
  0xf0   :  { %v592_v42 = vsub.s32 4294967266, %v1672_v27  ;;  %v824_v24 = vclz %v1049_v14  ;;  %v648_v37 = vsel %vm647_vm10, %v646_v45, 0  ;;  %v1689_v48 = vadd.s32 %v1361_v26, %v1367_v31 }
  0xf1   :  { %v108_v11 = vsub.s32 32, %v1659_v1  ;;  %v1692_v18 = vshrl.u32 %v457_v8, 30  ;;  %v650_v36 = vand.u32 31, %v648_v37  ;;  %v1700_v7 = vsel %vm518_vm8, %v602_v9, %v1522_v4  ;;  %v1053_v4 = vld [vmem:[%s2048_s0 + $0x7] ss:$0 sm:$0xff]  ;;  %s1163_s0 = smov [#allocation2]  }
  0xf2   :  { %v113_v22 = vadd.s32 127, %v112_v10  ;;  %v1020_v54 = vadd.s32 4294967294, %v224_v13  ;;  %v92_v26 = vadd.s32 %v1446_v44, %v1464_v59  ;;  %v643_v47 = vand.u32 8388607, %v2060_v55  ;;  %s1000_s18 = sshll.u32 %s1163_s0, 4  ;;  %s1001_s18 = int_to_ptr.vmem [resolvable:$true] %s1000_s18 }
  0xf3   :  { %v459_v31 = vshll.u32 %v1692_v18, 30  ;;  %v651_v52 = vsub.s32 32, %v650_v36  ;;  %v1709_v28 = vadd.s32 127, %v592_v42  ;;  %v1050_v53 = vadd.s32 4294967294, %v824_v24  ;;  %s1132_s19 = scalar_lea.vmem %s1001_s18, 128  ;;  %p1137_p1 = scmp.lt.s32.totalorder %s1001_s18, %s1001_s18 }
  0xf4   :  { %v109_v44 = vshll.u32 %v1577_v32, %v1659_v1  ;;  %v110_v59 = vshrl.u32 %v92_v26, %v108_v11  ;;  %v114_v49 = vshll.u32 %v113_v22, 23  ;;  %vm1021_vm11 = vcmp.lt.s32.totalorder %v1020_v54, 0  ;;  %p1133_p0 = scmp.ne.s32.totalorder %s1001_s18, %s1132_s19  ;;  %p1138_p2 = scmp.lt.s32.totalorder %s1132_s19, %s1132_s19 }
  0xf5   :  { %v1716_v21 = vsub.s32 %v456_v19, %v459_v31  ;;  %v654_v14 = vshrl.u32 %v2061_v39, %v651_v52  ;;  %v657_v45 = vshrl.u32 %v2063_v41, %v651_v52  ;;  %v2075_v9 = vmov 2102212464  }
  0xf6   :  { %v660_v10 = vshrl.u32 %v2075_v9, %v651_v52  ;;  %v644_v13 = vor.u32 8388608, %v643_v47  ;;  %v653_v8 = vshll.u32 %v2065_v46, %v650_v36  ;;  %v656_v42 = vshll.u32 %v2061_v39, %v650_v36  ;;  %p1139_p3 = por %p1138_p2, %p1137_p1 }
  0xf7   :  { %v874_v24 = vmul.f32 %v1053_v4, %v1212_v12  ;;  %v462_v32 = vsub.s32 0, %v1716_v21  ;;  %v659_v1 = vshll.u32 %v2063_v41, %v650_v36  ;;  %v662_v19 = vshll.u32 %v2075_v9, %v650_v36 }
  0xf8   :  { %v663_v11 = vshrl.u32 %v2067_v30, %v651_v52  ;;  %v1728_v22 = vsel %vm1021_vm11, 0, %v1020_v54  ;;  %v649_v26 = vshrl.u32 %v648_v37, 5  ;;  %v655_v31 = vor.u32 %v654_v14, %v653_v8  ;;  %p1140_p4 = pnand %p1139_p3, %p1133_p0 }
  0xf9   :  { %v2076_v55 = vmov 1326507024   ;;  %v658_v60 = vor.u32 %v657_v45, %v656_v42  ;;  %v661_v20 = vor.u32 %v660_v10, %v659_v1  ;;  %v665_v39 = vshll.u32 %v2067_v30, %v650_v36 }
  0xfa   :  { %v666_v47 = vshrl.u32 %v2076_v55, %v651_v52  ;;  %v664_v17 = vor.u32 %v663_v11, %v662_v19  ;;  %v588_v12 = vsub.s32 32, %v1672_v27  ;;  %v594_v4 = vshll.u32 %v1709_v28, 23 }
  0xfb   :  { %vm1051_vm12 = vcmp.lt.s32.totalorder %v1050_v53, 0  ;;  %v1735_v41 = vadd.f32 %v874_v24, %v1218_v15  ;;  %v111_v46 = vor.u32 %v110_v59, %v109_v44  ;;  %v115_v54 = vor.u32 4788187, %v114_v49 }
  0xfc   :  { %v1031_v37 = vmin.u32 %v462_v32, %v1716_v21  ;;  %v667_v14 = vor.u32 %v666_v47, %v665_v39  ;;  %v232_v8 = vsub.s32 4294967266, %v1728_v22  ;;  %vm668_vm13 = vcmp.lt.s32.totalorder %v649_v26, 1 }
  0xfd   :  { %vm671_vm14 = vcmp.lt.s32.totalorder %v649_v26, 4  ;;  %v684_v45 = vshll.u32 %v644_v13, 8  ;;  %vm670_vm15 = vcmp.lt.s32.totalorder %v649_v26, 3  ;;  %v676_v10 = vsel %vm668_vm13, %v655_v31, %v658_v60 }
  0xfe   :  { %v673_v36 = vsel %vm671_vm14, %v661_v20, 2102212464  ;;  %v677_v42 = vsel %vm671_vm14, %v664_v17, 920167782  ;;  %v2077_v28 = vmov 683565275   ;;  %v464_v49 = vclz %v1031_v37 }
  0xff   :  { %v652_v1 = vshrl.u32 %v2077_v28, %v651_v52  ;;  %vm669_vm0 = vcmp.lt.s32.totalorder %v649_v26, 2  ;;  %v678_v15 = vsel %vm670_vm15, %v661_v20, %v677_v42  ;;  %v879_v44 = vand.u32 2139095040, %v1735_v41 }
 0x100   :  { %v2078_v59 = vand.u32 2147483647, %v1229_v23  ;;  %v679_v13 = vsel %vm669_vm0, %v676_v10, %v678_v15  ;;  %v680_v24 = vsel %vm668_vm13, %v658_v60, %v661_v20  ;;  %v681_v32 = vsel %vm671_vm14, %v667_v14, 1326507024 }
 0x101   :  { %v116_v19 = vand.u32 2147483647, %v115_v54  ;;  %v672_v52 = vsel %vm668_vm13, %v652_v1, %v655_v31  ;;  %v674_v11 = vsel %vm670_vm15, %v658_v60, %v673_v36  ;;  %v682_v47 = vsel %vm670_vm15, %v664_v17, %v681_v32 }
 0x102   :  { %vm1745_vm1 = vcmp.le.f32.partialorder %v2078_v59, 0.7853982  ;;  %v233_v42 = vadd.s32 127, %v232_v8  ;;  %v683_v30 = vsel %vm669_vm0, %v680_v24, %v682_v47  ;;  %v1760_v37 = vsel %vm1051_vm12, 0, %v1050_v53 }
 0x103   :  { %v1755_v59 = vmul.u32.u64.low %v684_v45, %v679_v13  ;;  %v1756_v29 = vmul.u32.u64.high %v684_v45, %v679_v13, %v1755_v59  ;;  %v118_v10 = vcvt.s32.f32 %v111_v46  ;;  %vm38_vm2 = vcmp.lt.s32.totalorder %v1273_v63, 0 }
 0x104   :  { %v1762_v20 = vmul.u32.u64.low %v684_v45, %v683_v30  ;;  %v1763_v14 = vmul.u32.u64.high %v684_v45, %v683_v30, %v1762_v20  ;;  %v228_v60 = vsub.s32 32, %v1728_v22  ;;  %v1032_v31 = vadd.s32 4294967294, %v464_v49 }
 0x105   :  { %v675_v17 = vsel %vm669_vm0, %v672_v52, %v674_v11  ;;  %v880_v54 = vshrl.u32 %v879_v44, 23  ;;  %v2081_v8 = vand.u32 2147483647, %v1684_v5  ;;  %v2082_v36 = vcvt.s32.f32 %v1681_v35 }
 0x106   :  { %v589_v53 = vshll.u32 %v1555_v50, %v1672_v27  ;;  %v590_v46 = vshrl.u32 %v1689_v48, %v588_v12  ;;  %v119_v30 = vmul.f32 %v118_v10, %v116_v19  ;;  %v212_v15 = vadd.s32 %v1583_v38, %v1591_v43 }
 0x107   :  { %v359_v1 = vmul.f32 %v2082_v36, %v2081_v8  ;;  %v234_v13 = vshll.u32 %v233_v42, 23  ;;  %v694_v49 = vadd.s32 1, %v1756_v29  ;;  %v1054_v26 = vadd.s32 4294967169, %v880_v54 }
 0x108   :  { %v595_v24 = vor.u32 4788187, %v594_v4  ;;  %v832_v44 = vsub.s32 4294967266, %v1760_v37  ;;  %v2083_v5 = vand.u32 2147483647, %v1273_v63  ;;  %v691_v50 = vmul.u32 %v684_v45, %v675_v17 }
 0x109   :  { %vm693_vm5 = vc.u32 %v1763_v14, %v1755_v59  ;;  %v230_v27 = vshrl.u32 %v212_v15, %v228_v60  ;;  %vm1033_vm6 = vcmp.lt.s32.totalorder %v1032_v31, 0  ;;  %v886_v43 = vadd.s32 1, %v1054_v26 }
 0x10a   :  { %vm1781_vm3 = vcmp.le.f32.partialorder %v2083_v5, 0.7853982  ;;  %v695_v38 = vsel %vm693_vm5, %v694_v49, %v1756_v29  ;;  %v591_v48 = vor.u32 %v590_v46, %v589_v53  ;;  %v120_v4 = vxor.u32 2147483648, %v119_v30 }
 0x10b   :  { %v696_v32 = vadd.s32 %v695_v38, %v691_v50  ;;  %v360_v19 = vxor.u32 2147483648, %v359_v1  ;;  %v229_v52 = vshll.u32 %v1629_v51, %v1728_v22  ;;  %v235_v45 = vor.u32 4788187, %v234_v13 }
 0x10c   :  { %vm887_vm7 = vcmp.gt.s32.totalorder %v886_v43, 0  ;;  %v596_v11 = vand.u32 2147483647, %v595_v24  ;;  %v467_v47 = vsel %vm1033_vm6, 0, %v1032_v31  ;;  %v828_v29 = vsub.s32 32, %v1760_v37 }
 0x10d   :  { %v697_v42 = vadd.s32 536870912, %v696_v32  ;;  %v888_v10 = vsel %vm887_vm7, %v886_v43, 0  ;;  %v1794_v20 = vadd.s32 127, %v832_v44  ;;  %v231_v60 = vor.u32 %v230_v27, %v229_v52 }
 0x10e   :  { %v890_v17 = vand.u32 31, %v888_v10  ;;  %v598_v54 = vcvt.s32.f32 %v591_v48  ;;  %v812_v8 = vadd.s32 %v1517_v3, %v1514_v56  ;;  %v121_v36 = vsel %vm38_vm2, %v120_v4, %v119_v30 }
 0x10f   :  { %v1800_v51 = vshrl.u32 %v697_v42, 30  ;;  %v236_v22 = vand.u32 2147483647, %v235_v45  ;;  %v472_v53 = vsub.s32 4294967266, %v467_v47  ;;  %v2071_v31 = vand.u32 2147483647, %v1735_v41 }
 0x110   :  { %v891_v46 = vsub.s32 32, %v890_v17  ;;  %v1805_v15 = vsel %vm278_vm4, %v360_v19, %v359_v1  ;;  %v1807_v13 = vmul.f32 %v598_v54, %v596_v11  ;;  %v829_v49 = vshll.u32 %v1634_v25, %v1760_v37 }
 0x111   :  { %v699_v56 = vshll.u32 %v1800_v51, 30  ;;  %v1812_v3 = vshrl.u32 %v812_v8, %v828_v29  ;;  %v1818_v26 = vsel %vm1781_vm3, %v1273_v63, %v121_v36  ;;  %v238_v24 = vcvt.s32.f32 %v231_v60 }
 0x112   :  { %v452_v1 = vadd.s32 %v1639_v0, %v1645_v61  ;;  %v468_v44 = vsub.s32 32, %v467_v47  ;;  %v2086_v50 = vmov 2131351028   ;;  %v473_v43 = vadd.s32 127, %v472_v53 }
 0x113   :  { %v1822_v5 = vsub.s32 %v696_v32, %v699_v56  ;;  %v897_v27 = vshrl.u32 %v2086_v50, %v891_v46  ;;  %v239_v38 = vmul.f32 %v238_v24, %v236_v22  ;;  %v883_v48 = vand.u32 8388607, %v2071_v31 }
 0x114   :  { %v2087_v4 = vmov 2475754826   ;;  %v1829_v45 = vshrl.u32 %v888_v10, 5  ;;  %v893_v11 = vshll.u32 %v2077_v28, %v890_v17  ;;  %v899_v61 = vshll.u32 %v2086_v50, %v890_v17 }
 0x115   :  { %v894_v19 = vshrl.u32 %v2087_v4, %v891_v46  ;;  %v702_v52 = vsub.s32 0, %v1822_v5  ;;  %v896_v0 = vshll.u32 %v2087_v4, %v890_v17  ;;  %v900_v32 = vshrl.u32 %v2075_v9, %v891_v46 }
 0x116   :  { %v902_v42 = vshll.u32 %v2075_v9, %v890_v17  ;;  %v2088_v29 = vmov 920167782   ;;  %vm158_vm4 = vcmp.lt.s32.totalorder %v1402_v58, 0  ;;  %v470_v54 = vshrl.u32 %v452_v1, %v468_v44 }
 0x117   :  { %v903_v60 = vshrl.u32 %v2088_v29, %v891_v46  ;;  %v1043_v8 = vmin.u32 %v702_v52, %v1822_v5  ;;  %v898_v36 = vor.u32 %v897_v27, %v896_v0  ;;  %v906_v10 = vshrl.u32 %v2076_v55, %v891_v46 }
 0x118   :  { %v895_v22 = vor.u32 %v894_v19, %v893_v11  ;;  %v901_v53 = vor.u32 %v900_v32, %v899_v61  ;;  %v905_v24 = vshll.u32 %v2088_v29, %v890_v17  ;;  %v240_v50 = vxor.u32 2147483648, %v239_v38 }
 0x119   :  { %v904_v56 = vor.u32 %v903_v60, %v902_v42  ;;  %v469_v4 = vshll.u32 %v1716_v21, %v467_v47  ;;  %v474_v31 = vshll.u32 %v473_v43, 23  ;;  %v704_v9 = vclz %v1043_v8 }
 0x11a   :  { %v884_v12 = vor.u32 8388608, %v883_v48  ;;  %v907_v30 = vor.u32 %v906_v10, %v905_v24  ;;  %vm908_vm10 = vcmp.lt.s32.totalorder %v1829_v45, 1  ;;  %vm911_vm11 = vcmp.lt.s32.totalorder %v1829_v45, 4 }
 0x11b   :  { %v2089_v1 = vand.u32 2147483647, %v1402_v58  ;;  %v1044_v44 = vadd.s32 4294967294, %v704_v9  ;;  %vm910_vm13 = vcmp.lt.s32.totalorder %v1829_v45, 3  ;;  %v917_v17 = vsel %vm911_vm11, %v904_v56, 920167782 }
 0x11c   :  { %v920_v21 = vsel %vm908_vm10, %v898_v36, %v901_v53  ;;  %v471_v47 = vor.u32 %v470_v54, %v469_v4  ;;  %v916_v27 = vsel %vm908_vm10, %v895_v22, %v898_v36  ;;  %v918_v43 = vsel %vm910_vm13, %v901_v53, %v917_v17 }
 0x11d   :  { %vm1846_vm12 = vcmp.le.f32.partialorder %v2089_v1, 0.7853982  ;;  %v921_v48 = vsel %vm911_vm11, %v907_v30, 1326507024  ;;  %v475_v19 = vor.u32 4788187, %v474_v31  ;;  %v892_v60 = vshrl.u32 %v2077_v28, %v891_v46 }
 0x11e   :  { %vm1045_vm14 = vcmp.lt.s32.totalorder %v1044_v44, 0  ;;  %vm909_vm15 = vcmp.lt.s32.totalorder %v1829_v45, 2  ;;  %v922_v52 = vsel %vm910_vm13, %v904_v56, %v921_v48  ;;  %v913_v0 = vsel %vm911_vm11, %v901_v53, 2102212464 }
 0x11f   :  { %v707_v11 = vsel %vm1045_vm14, 0, %v1044_v44  ;;  %v923_v61 = vsel %vm909_vm15, %v920_v21, %v922_v52  ;;  %v924_v32 = vshll.u32 %v884_v12, 8  ;;  %v919_v30 = vsel %vm909_vm15, %v916_v27, %v918_v43 }
 0x120   :  { %v708_v42 = vsub.s32 32, %v707_v11  ;;  %v712_v29 = vsub.s32 4294967266, %v707_v11  ;;  %v241_v31 = vsel %vm158_vm4, %v240_v50, %v239_v38  ;;  %v692_v54 = vadd.s32 %v1755_v59, %v1763_v14 }
 0x121   :  { %v1869_v8 = vmul.u32.u64.low %v924_v32, %v923_v61  ;;  %v1870_v10 = vmul.u32.u64.high %v924_v32, %v923_v61, %v1869_v8  ;;  %v476_v53 = vand.u32 2147483647, %v475_v19  ;;  %v912_v12 = vsel %vm908_vm10, %v892_v60, %v895_v22 }
 0x122   :  { %v713_v56 = vadd.s32 127, %v712_v29  ;;  %v914_v28 = vsel %vm910_vm13, %v898_v36, %v913_v0  ;;  %v831_v46 = vor.u32 %v1812_v3, %v829_v49  ;;  %v2092_v38 = vshll.u32 %v1794_v20, 23 }
 0x123   :  { %v1882_v59 = vmul.u32.u64.low %v924_v32, %v919_v30  ;;  %v1883_v14 = vmul.u32.u64.high %v924_v32, %v919_v30, %v1882_v59  ;;  %v122_v50 = vsub.s32 4, %v1552_v40  ;;  %v478_v4 = vcvt.s32.f32 %v471_v47 }
 0x124   :  { %v835_v24 = vor.u32 4788187, %v2092_v38  ;;  %v710_v9 = vshrl.u32 %v692_v54, %v708_v42  ;;  %v714_v22 = vshll.u32 %v713_v56, 23  ;;  %1100 = vcosq.f32 %v1818_v26 }
 0x125   :  { %v242_v36 = vsub.s32 4, %v1622_v2  ;;  %v244_v25 = vsel %vm1846_vm12, %v1402_v58, %v241_v31  ;;  %v915_v37 = vsel %vm909_vm15, %v912_v12, %v914_v28  ;;  %v479_v20 = vmul.f32 %v478_v4, %v476_v53 }
 0x126   :  { %v709_v49 = vshll.u32 %v1822_v5, %v707_v11  ;;  %v715_v3 = vor.u32 4788187, %v714_v22  ;;  %vm933_vm0 = vc.u32 %v1870_v10, %v1882_v59  ;;  %v364_v1 = vsel %vm1666_vm9, %v1221_v16, %v1805_v15 }
 0x127   :  { %v836_v44 = vand.u32 2147483647, %v835_v24  ;;  %1102 = vsinq.f32 %v1818_v26  ;;  %v934_v17 = vadd.s32 1, %v1883_v14  ;;  %v600_v45 = vxor.u32 2147483648, %v1807_v13 }
 0x128   :  { %1104 = vcosq.f32 %v244_v25  ;;  %v711_v21 = vor.u32 %v710_v9, %v709_v49  ;;  %v931_v47 = vmul.u32 %v924_v32, %v915_v37  ;;  %v838_v5 = vcvt.s32.f32 %v831_v46  ;;  %v2101_v49 = vld [vmem:[#allocation5_spill] sm:$0xff] }
 0x129   :  { %v123_v27 = vsel %vm38_vm2, %v122_v50, %v1552_v40  ;;  %1106 = vsinq.f32 %v244_v25  ;;  %v935_v43 = vsel %vm933_vm0, %v934_v17, %v1883_v14  ;;  %v243_v15 = vsel %vm158_vm4, %v242_v36, %v1622_v2 }
 0x12a   :  { %v480_v26 = vxor.u32 2147483648, %v479_v20  ;;  %v716_v48 = vand.u32 2147483647, %v715_v3  ;;  %v936_v19 = vadd.s32 %v935_v43, %v931_v47  ;;  %v2093_v52 = vsel %vm1666_vm9, 0, %v1677_v33 }
 0x12b   :  { %v369_v11 = vadd.s32 3, %v2093_v52  ;;  %v839_v0 = vmul.f32 %v838_v5, %v836_v44  ;;  %v2094_v40 = vsel %vm1745_vm1, 0, %v1700_v7  ;;  %v125_v32 = vsel %vm1781_vm3, 0, %v123_v27 }
 0x12c   :  { %v609_v61 = vadd.s32 3, %v2094_v40  ;;  %v718_v42 = vcvt.s32.f32 %v711_v21  ;;  %v937_v29 = vadd.s32 536870912, %v936_v19  ;;  %1108 = vcosq.f32 %v364_v1 }
 0x12d   :  { %v601_v2 = vsel %vm518_vm8, %v600_v45, %v1807_v13  ;;  %v245_v57 = vsel %vm1846_vm12, 0, %v243_v15  ;;  %vm398_vm9 = vcmp.lt.s32.totalorder %v1529_v6, 0  ;;  %1110 = vsinq.f32 %v364_v1 }
 0x12e   :  { %v481_v33 = vsel %vm398_vm9, %v480_v26, %v479_v20  ;;  %v719_v7 = vmul.f32 %v718_v42, %v716_v48  ;;  %v1929_v60 = vshrl.u32 %v937_v29, 30  ;;  %v1101_v35 = vpop.eup %1100  ;;  %v840_v30 = vxor.u32 2147483648, %v839_v0 }
 0x12f   :  { %v842_v31 = vsub.s32 4, %v1607_v34  ;;  %v129_v54 = vadd.s32 3, %v125_v32  ;;  %v604_v13 = vsel %vm1745_vm1, %v1229_v23, %v601_v2  ;;  %v249_v55 = vadd.s32 3, %v245_v57 }
 0x130   :  { %v2095_v8 = vand.u32 2147483647, %v1529_v6  ;;  %v939_v56 = vshll.u32 %v1929_v60, 30  ;;  %v2098_v28 = vand.u32 2147483647, %v1270_v62  ;;  %vm758_vm3 = vcmp.lt.s32.totalorder %v1270_v62, 0 }
 0x131   :  { %v1103_v12 = vpop.eup %1102  ;;  %v482_v39 = vsub.s32 4, %v1692_v18  ;;  %v1953_v14 = vand.u32 3, %v369_v11  ;;  %v1955_v50 = vand.u32 3, %v609_v61  ;;  %v720_v4 = vxor.u32 2147483648, %v719_v7 }
 0x132   :  { %vm1937_vm8 = vcmp.le.f32.partialorder %v2095_v8, 0.7853982  ;;  %vm1944_vm2 = vcmp.le.f32.partialorder %v2098_v28, 0.7853982  ;;  %v1105_v24 = vpop.eup %1104  ;;  %v1957_v9 = vsub.s32 %v936_v19, %v939_v56  ;;  %1112 = vcosq.f32 %v604_v13 }
 0x133   :  { %v484_v38 = vsel %vm1937_vm8, %v1529_v6, %v481_v33  ;;  %v1107_v22 = vpop.eup %1106  ;;  %v841_v36 = vsel %vm758_vm3, %v840_v30, %v839_v0  ;;  %v1960_v25 = vsel %vm758_vm3, %v842_v31, %v1607_v34  ;;  %v130_v37 = vand.u32 3, %v129_v54  ;;  %v143_v31 = vpop.permute.xlu1 %142 }
 0x134   :  { %v250_v20 = vand.u32 3, %v249_v55  ;;  %1114 = vcosq.f32 %v484_v38  ;;  %vm638_vm1 = vcmp.lt.s32.totalorder %v2101_v49, 0  ;;  %v942_v3 = vsub.s32 0, %v1957_v9 }
 0x135   :  { %v133_v1 = vxor.u32 2147483648, %v1103_v12  ;;  %v136_v44 = vxor.u32 2147483648, %v1101_v35  ;;  %v483_v17 = vsel %vm398_vm9, %v482_v39, %v1692_v18  ;;  %1116 = vsinq.f32 %v484_v38 }
 0x136   :  { %vm372_vm5 = vcmp.eq.s32.totalorder %v1953_v14, 0  ;;  %vm375_vm6 = vcmp.eq.s32.totalorder %v1953_v14, 2  ;;  %v253_v34 = vxor.u32 2147483648, %v1107_v22  ;;  %v256_v45 = vxor.u32 2147483648, %v1105_v24  ;;  %v1109_v5 = vpop.eup %1108 }
 0x137   :  { %v721_v21 = vsel %vm638_vm1, %v720_v4, %v719_v7  ;;  %v1055_v47 = vmin.u32 %v942_v3, %v1957_v9  ;;  %1118 = vsinq.f32 %v604_v13  ;;  %v844_v27 = vsel %vm1944_vm2, %v1270_v62, %v841_v36  ;;  %v1111_v18 = vpop.eup %1110 }
 0x138   :  { %vm132_vm7 = vcmp.eq.s32.totalorder %v130_v37, 0  ;;  %vm135_vm4 = vcmp.eq.s32.totalorder %v130_v37, 2  ;;  %vm128_vm10 = vweird.f32 %v1273_v63  ;;  %vm252_vm11 = vcmp.eq.s32.totalorder %v250_v20, 0  ;;  %v263_v63 = vpop.permute.xlu1 %262 }
 0x139   :  { %vm255_vm12 = vcmp.eq.s32.totalorder %v250_v20, 2  ;;  %v2102_v43 = vand.u32 2147483647, %v2101_v49  ;;  %v944_v26 = vclz %v1055_v47  ;;  %v134_v48 = vsel %vm132_vm7, %v1101_v35, %v133_v1 }
 0x13a   :  { %v137_v19 = vsel %vm135_vm4, %v136_v44, %v1103_v12  ;;  %v485_v52 = vsel %vm1937_vm8, 0, %v483_v17  ;;  %v254_v0 = vsel %vm252_vm11, %v1105_v24, %v253_v34  ;;  %v257_v40 = vsel %vm255_vm12, %v256_v45, %v1107_v22 }
 0x13b   :  { %vm1978_vm13 = vcmp.le.f32.partialorder %v2102_v43, 0.7853982  ;;  %v722_v61 = vsub.s32 4, %v1800_v51  ;;  %v1056_v32 = vadd.s32 4294967294, %v944_v26  ;;  %v373_v42 = vxor.u32 2147483648, %v1111_v18 }
 0x13c   :  { %v724_v11 = vsel %vm1978_vm13, %v2101_v49, %v721_v21  ;;  %v376_v29 = vxor.u32 2147483648, %v1109_v5  ;;  %1120 = vcosq.f32 %v844_v27  ;;  %vm131_vm14 = vcmp.lt.s32.totalorder %v130_v37, 2  ;;  %v1113_v57 = vpop.eup %1112 }
 0x13d   :  { %v138_v2 = vsel %vm131_vm14, %v134_v48, %v137_v19  ;;  %vm251_vm15 = vcmp.lt.s32.totalorder %v250_v20, 2  ;;  %1122 = vcosq.f32 %v724_v11  ;;  %vm1057_vm0 = vcmp.lt.s32.totalorder %v1056_v32, 0 }
 0x13e   :  { %v258_v33 = vsel %vm251_vm15, %v254_v0, %v257_v40  ;;  %v489_v7 = vadd.s32 3, %v485_v52  ;;  %1124 = vsinq.f32 %v724_v11  ;;  %v947_v35 = vsel %vm1057_vm0, 0, %v1056_v32  ;;  %v1115_v30 = vpop.eup %1114  ;;  %v383_v52 = vpop.permute.xlu0 %382 }
 0x13f   :  { %vm368_vm9 = vweird.f32 %v1221_v16  ;;  %v723_v54 = vsel %vm638_vm1, %v722_v61, %v1800_v51  ;;  %v932_v13 = vadd.s32 %v1882_v59, %v1870_v10  ;;  %v948_v55 = vsub.s32 32, %v947_v35  ;;  %v1117_v53 = vpop.eup %1116 }
 0x140   :  { %v952_v8 = vsub.s32 4294967266, %v947_v35  ;;  %v374_v56 = vsel %vm372_vm5, %v1109_v5, %v373_v42  ;;  %v377_v12 = vsel %vm375_vm6, %v376_v29, %v1111_v18  ;;  %v845_v28 = vsel %vm1944_vm2, 0, %v1960_v25 }
 0x141   :  { %vm248_vm8 = vweird.f32 %v1402_v58  ;;  %1126 = vsinq.f32 %v844_v27  ;;  %v949_v51 = vshll.u32 %v1957_v9, %v947_v35  ;;  %v950_v39 = vshrl.u32 %v932_v13, %v948_v55  ;;  %v1119_v59 = vpop.eup %1118  ;;  %v503_v55 = vpop.permute.xlu1 %502 }
 0x142   :  { %v953_v10 = vadd.s32 127, %v952_v8  ;;  %v139_v38 = vsel %vm128_vm10, nan, %v138_v2  ;;  %v259_v24 = vsel %vm248_vm8, nan, %v258_v33  ;;  %v490_v4 = vand.u32 3, %v489_v7 }
 0x143   :  { %v725_v22 = vsel %vm1978_vm13, 0, %v723_v54  ;;  %v493_v36 = vxor.u32 2147483648, %v1117_v53  ;;  %v496_v37 = vxor.u32 2147483648, %v1115_v30  ;;  %v951_v46 = vor.u32 %v950_v39, %v949_v51  ;;  %v623_v39 = vpop.permute.xlu0 %622 }
 0x144   :  { %v954_v25 = vshll.u32 %v953_v10, 23  ;;  %vm371_vm2 = vcmp.lt.s32.totalorder %v1953_v14, 2  ;;  %vm615_vm3 = vcmp.eq.s32.totalorder %v1955_v50, 2  ;;  %v616_v58 = vxor.u32 2147483648, %v1113_v57 }
 0x145   :  { %v849_v9 = vadd.s32 3, %v845_v28  ;;  %v378_v20 = vsel %vm371_vm2, %v374_v56, %v377_v12  ;;  %v613_v3 = vxor.u32 2147483648, %v1119_v59  ;;  %v145_v1 = vmul.f32 %v143_v31, %v139_v38 }
 0x146   :  { %v955_v44 = vor.u32 4788187, %v954_v25  ;;  %v1121_v17 = vpop.eup %1120  ;;  %v265_v34 = vmul.f32 %v263_v63, %v259_v24  ;;  %vm492_vm1 = vcmp.eq.s32.totalorder %v490_v4, 0  ;;  %vm495_vm5 = vcmp.eq.s32.totalorder %v490_v4, 2 }
 0x147   :  { %v729_v45 = vadd.s32 3, %v725_v22  ;;  %v1123_v21 = vpop.eup %1122  ;;  %v494_v47 = vsel %vm492_vm1, %v1115_v30, %v493_v36  ;;  %v497_v5 = vsel %vm495_vm5, %v496_v37, %v1117_v53  ;;  %v958_v18 = vcvt.s32.f32 %v951_v46  ;;  %v743_v36 = vpop.permute.xlu1 %742 }
 0x148   :  { %v956_v27 = vand.u32 2147483647, %v955_v44  ;;  %v1125_v14 = vpop.eup %1124  ;;  %v379_v43 = vsel %vm368_vm9, nan, %v378_v20  ;;  %vm611_vm6 = vcmp.lt.s32.totalorder %v1955_v50, 2  ;;  %vm612_vm7 = vcmp.eq.s32.totalorder %v1955_v50, 0 }
 0x149   :  { %v617_v15 = vsel %vm615_vm3, %v616_v58, %v1119_v59  ;;  %v614_v26 = vsel %vm612_vm7, %v1113_v57, %v613_v3  ;;  %vm491_vm4 = vcmp.lt.s32.totalorder %v490_v4, 2  ;;  %v962_v19 = vsub.s32 4, %v1929_v60 }
 0x14a   :  { %v959_v48 = vmul.f32 %v958_v18, %v956_v27  ;;  %v850_v11 = vand.u32 3, %v849_v9  ;;  %v266_v0 = vadd.f32 %v265_v34, %v145_v1  ;;  %v498_v40 = vsel %vm491_vm4, %v494_v47, %v497_v5  ;;  %v863_v1 = vpop.permute.xlu0 %862 }
 0x14b   :  { %v730_v61 = vand.u32 3, %v729_v45  ;;  %v1127_v32 = vpop.eup %1126  ;;  %v385_v16 = vmul.f32 %v383_v52, %v379_v43  ;;  %v733_v42 = vxor.u32 2147483648, %v1125_v14  ;;  %v736_v29 = vxor.u32 2147483648, %v1123_v21 }
 0x14c   :  { %v960_v2 = vxor.u32 2147483648, %v959_v48  ;;  %v618_v33 = vsel %vm611_vm6, %v614_v26, %v617_v15  ;;  %v856_v7 = vxor.u32 2147483648, %v1121_v17  ;;  %vm488_vm10 = vweird.f32 %v1529_v6 }
 0x14d   :  { %vm878_vm11 = vcmp.lt.s32.totalorder %v1735_v41, 0  ;;  %v499_v57 = vsel %vm488_vm10, nan, %v498_v40  ;;  %v2105_v35 = vand.u32 2147483647, %v1735_v41  ;;  %v386_v13 = vadd.f32 %v385_v16, %v266_v0 }
 0x14e   :  { %v961_v31 = vsel %vm878_vm11, %v960_v2, %v959_v48  ;;  %v963_v54 = vsel %vm878_vm11, %v962_v19, %v1929_v60  ;;  %vm732_vm13 = vcmp.eq.s32.totalorder %v730_v61, 0  ;;  %vm735_vm14 = vcmp.eq.s32.totalorder %v730_v61, 2  ;;  %v990_v27 = vpop.permute.xlu0 %989 }
 0x14f   :  { %vm2022_vm12 = vcmp.le.f32.partialorder %v2105_v35, 0.7853982  ;;  %v853_v6 = vxor.u32 2147483648, %v1127_v32  ;;  %v734_v8 = vsel %vm732_vm13, %v1123_v21, %v733_v42  ;;  %v737_v53 = vsel %vm735_vm14, %v736_v29, %v1125_v14  ;;  %v983_v21 = vpop.permute.xlu1 %982 }
 0x150   :  { %v964_v50 = vsel %vm2022_vm12, %v1735_v41, %v961_v31  ;;  %vm608_vm15 = vweird.f32 %v1229_v23  ;;  %v505_v56 = vmul.f32 %v503_v55, %v499_v57  ;;  %v965_v12 = vsel %vm2022_vm12, 0, %v963_v54 }
 0x151   :  { %1128 = vcosq.f32 %v964_v50  ;;  %v619_v60 = vsel %vm608_vm15, nan, %v618_v33  ;;  %vm731_vm0 = vcmp.lt.s32.totalorder %v730_v61, 2  ;;  %vm852_vm9 = vcmp.eq.s32.totalorder %v850_v11, 0 }
 0x152   :  { %1130 = vsinq.f32 %v964_v50  ;;  %vm855_vm8 = vcmp.eq.s32.totalorder %v850_v11, 2  ;;  %v506_v28 = vadd.f32 %v505_v56, %v386_v13  ;;  %v738_v51 = vsel %vm731_vm0, %v734_v8, %v737_v53 }
 0x153   :  { %v854_v10 = vsel %vm852_vm9, %v1121_v17, %v853_v6  ;;  %v857_v59 = vsel %vm855_vm8, %v856_v7, %v1127_v32  ;;  %v969_v38 = vadd.s32 3, %v965_v12  ;;  %v625_v24 = vmul.f32 %v623_v39, %v619_v60 }
 0x154   :  { %vm728_vm2 = vweird.f32 %v2101_v49  ;;  %vm851_vm3 = vcmp.lt.s32.totalorder %v850_v11, 2  ;;  %vm848_vm1 = vweird.f32 %v1270_v62  ;;  %vm968_vm4 = vweird.f32 %v1735_v41 }
 0x155   :  { %v739_v23 = vsel %vm728_vm2, nan, %v738_v51  ;;  %v858_v4 = vsel %vm851_vm3, %v854_v10, %v857_v59  ;;  %v626_v22 = vadd.f32 %v625_v24, %v506_v28  ;;  %v970_v37 = vand.u32 3, %v969_v38 }
 0x156   :  { %v745_v46 = vmul.f32 %v743_v36, %v739_v23  ;;  %v859_v58 = vsel %vm848_vm1, nan, %v858_v4 }
 0x157   :  { %vm975_vm5 = vcmp.eq.s32.totalorder %v970_v37, 2  ;;  %v865_v44 = vmul.f32 %v863_v1, %v859_v58  ;;  %vm972_vm6 = vcmp.eq.s32.totalorder %v970_v37, 0  ;;  %vm971_vm7 = vcmp.lt.s32.totalorder %v970_v37, 2 }
 0x158   :  { %v746_v20 = vadd.f32 %v745_v46, %v626_v22 }
 0x15a   :  { %v866_v34 = vadd.f32 %v865_v44, %v746_v20 }
 0x15b   :  { %v1129_v25 = vpop.eup %1128 }
 0x15c   :  { %v1131_v9 = vpop.eup %1130  ;;  %v976_v3 = vxor.u32 2147483648, %v1129_v25 }
 0x15d   :  { %v973_v63 = vxor.u32 2147483648, %v1131_v9 }
 0x15e   :  { %v977_v49 = vsel %vm975_vm5, %v976_v3, %v1131_v9 }
 0x15f   :  { %v974_v17 = vsel %vm972_vm6, %v1129_v25, %v973_v63 }
 0x160   :  { %v978_v45 = vsel %vm971_vm7, %v974_v17, %v977_v49 }
 0x161   :  { %v979_v62 = vsel %vm968_vm4, nan, %v978_v45 }
 0x162   :  { %v985_v47 = vmul.f32 %v983_v21, %v979_v62 }
 0x164   :  { %v986_v5 = vadd.f32 %v985_v47, %v866_v34 }
 0x166   :  { %v992_v18 = vsub.f32 %v986_v5, %v990_v27 }
 0x168   :  { %993 = vst [vmem:[#allocation2] sm:$0xff] %v992_v18 }
 0x169   :  { %1143 = shalt.err (!%p1140_p4)
}
 0x16a   :  { %s1144_s22 = scalar_lea.hbm %s2050_s2, 128 }
 0x16b   :  { %p1145_p5 = scmp.ne.s32.totalorder %s2050_s2, %s1144_s22  ;;  %p1148_p6 = scmp.lt.u32.totalorder %s1144_s22, %s2050_s2 }
 0x16d   :  { %p1150_p7 = pnand %p1148_p6, %p1145_p5 }
 0x16f   :  { %1153 = shalt.err (!%p1150_p7)
}
 0x170   :  { %1003 = dma.vmem_to_hbm [thread:$0]  %s1001_s18, 128, %s2050_s2, [#allocation3]  }
 0x171   :  { %1154 = dma.done.wait [#allocation3], 128  }
 0x172   :  { %1155 = vsyncadd [#allocation3], 4294967168 }
 0x173   :  { %1007 = vsyncpa [#allocation3], 1 }

</bundles_post_ra>
